<compile_context>
chip_gen: v5e
topology: v5e:2x2
jax: 0.10.0
libtpu: 0.0.40
codegen_flags: <defaults>
</compile_context>

<pallas_src>
import jax
import jax.numpy as jnp
import numpy as np
from jax.experimental import pallas as pl
from jax.experimental.pallas import tpu as pltpu

EPS = 1e-5


# ---------------------------------------------------------------------------
# Parameter helpers (deterministic, synthetic)
# ---------------------------------------------------------------------------
def _fold_bn(w_hwio, gamma, beta, mean, var):
    """Fold eval-mode BN (gamma,beta,mean,var) into a bias-free conv."""
    scale = gamma / jnp.sqrt(var + EPS)          # (Cout,)
    w_f = w_hwio * scale                          # broadcast over last (Cout) dim
    b_f = beta - mean * scale                     # (Cout,)
    return w_f.astype(jnp.float32), b_f.astype(jnp.float32)


def make_params(key, cin, ch):
    ks = jax.random.split(key, 10)

    def conv_w(k, kh, kw, ci, co):
        return 0.1 * jax.random.normal(k, (kh, kw, ci, co), jnp.float32)

    def bn_p(k):
        k1, k2, k3, k4 = jax.random.split(k, 4)
        gamma = 1.0 + 0.1 * jax.random.normal(k1, (ch,), jnp.float32)
        beta = 0.05 * jax.random.normal(k2, (ch,), jnp.float32)
        mean = 0.05 * jax.random.normal(k3, (ch,), jnp.float32)
        var = jax.random.uniform(k4, (ch,), jnp.float32, minval=0.5, maxval=1.5)
        return (gamma, beta, mean, var)

    return dict(
        b0_w1=conv_w(ks[0], 3, 3, cin, ch), b0_bn1=bn_p(ks[1]),
        b0_w2=conv_w(ks[2], 3, 3, ch, ch),  b0_bn2=bn_p(ks[3]),
        b0_wd=conv_w(ks[4], 1, 1, cin, ch), b0_bnd=bn_p(ks[5]),
        b1_w1=conv_w(ks[6], 3, 3, ch, ch),  b1_bn1=bn_p(ks[7]),
        b1_w2=conv_w(ks[8], 3, 3, ch, ch),  b1_bn2=bn_p(ks[9]),
    )


def prepare_params(P):
    """One-time prep: fold BN, pack/pad weights, cast matmul operands to bf16."""
    cin = P['b0_w1'].shape[2]
    ch = P['b0_w1'].shape[3]
    k1p = ((9 * cin + 127) // 128) * 128          # pad im2col K to lane multiple

    w1, b1 = _fold_bn(P['b0_w1'], *P['b0_bn1'])
    w2, b2 = _fold_bn(P['b0_w2'], *P['b0_bn2'])
    wd, bd = _fold_bn(P['b0_wd'], *P['b0_bnd'])
    w1b, b1b = _fold_bn(P['b1_w1'], *P['b1_bn1'])
    w2b, b2b = _fold_bn(P['b1_w2'], *P['b1_bn2'])

    # combined weight for {block0 conv1 | block0 1x1 downsample}:
    #   cols [0,ch)      : 3x3 stride-2 conv1 (all 9 taps)
    #   cols [ch,2*ch)   : 1x1 stride-2 downsample = centre tap (ky=kx=1) only
    wf = jnp.zeros((k1p, 2 * ch), jnp.float32)
    wf = wf.at[:9 * cin, :ch].set(w1.reshape(9 * cin, ch))
    wf = wf.at[4 * cin:5 * cin, ch:].set(wd.reshape(cin, ch))
    bf = jnp.concatenate([b1, bd]).reshape(1, 2 * ch)

    # stacked 3x3 s1 conv weights/biases: [block0.conv2, block1.conv1, block1.conv2]
    w3 = jnp.stack([w2.reshape(9 * ch, ch),
                    w1b.reshape(9 * ch, ch),
                    w2b.reshape(9 * ch, ch)], axis=0)           # (3, 9*ch, ch)
    b3 = jnp.stack([b2.reshape(1, ch),
                    b1b.reshape(1, ch),
                    b2b.reshape(1, ch)], axis=0)                # (3, 1, ch)

    return dict(
        wf=wf.astype(jnp.bfloat16), bf=bf,
        w3=w3.astype(jnp.bfloat16), b3=b3,
    )


# ---------------------------------------------------------------------------
# Fused Pallas kernel: both BasicBlocks, one grid step per batch image
# ---------------------------------------------------------------------------
def fused_head_kernel(p1_ref, wf_ref, bf_ref, w3_ref, b3_ref, out_ref, pad_ref):
    HO = pad_ref.shape[0] - 2
    WO = pad_ref.shape[1] - 2
    CH = pad_ref.shape[2]
    HW = HO * WO

    # Zero only the 1-pixel border of the padded scratch; the interior is
    # fully overwritten before every use.
    zrow = jnp.zeros((1, WO + 2, CH), jnp.float32)
    zcol = jnp.zeros((HO, 1, CH), jnp.float32)
    pad_ref[0:1, :, :] = zrow
    pad_ref[HO + 1:HO + 2, :, :] = zrow
    pad_ref[1:HO + 1, 0:1, :] = zcol
    pad_ref[1:HO + 1, WO + 1:WO + 2, :] = zcol

    def conv3x3(idx):
        """3x3 s1 p1 conv on the scratch interior as one K=9*CH matmul + bias."""
        pad = pad_ref[...]                                        # (HO+2, WO+2, CH)
        taps = jnp.concatenate(
            [pad[ky:ky + HO, kx:kx + WO, :].reshape(HW, CH)
             for ky in range(3) for kx in range(3)], axis=-1)     # (HW, 9*CH)
        y = jnp.dot(taps.astype(jnp.bfloat16), w3_ref[idx],
                    preferred_element_type=jnp.float32)           # (HW, CH) f32
        return y + b3_ref[idx]

    # ---- block0: conv1 (3x3 s2, im2col) + 1x1 s2 downsample in ONE matmul
    yf = jnp.dot(p1_ref[0], wf_ref[...], preferred_element_type=jnp.float32)
    yf = yf + bf_ref[...]                                          # (HW, 2*CH)
    y1 = jnp.maximum(yf[:, :CH], 0.0)                              # BN1 + ReLU
    sc = yf[:, CH:]                                                # downsample + BN

    # ---- block0: conv2 (3x3 s1) + BN2, add shortcut, ReLU
    pad_ref[1:1 + HO, 1:1 + WO, :] = y1.reshape(HO, WO, CH)
    y0 = jnp.maximum(conv3x3(0) + sc, 0.0)                         # (HW, CH) f32

    # ---- block1: conv1 (3x3 s1) + BN1 + ReLU
    pad_ref[1:1 + HO, 1:1 + WO, :] = y0.reshape(HO, WO, CH)
    z = jnp.maximum(conv3x3(1), 0.0)

    # ---- block1: conv2 (3x3 s1) + BN2, identity residual, ReLU
    pad_ref[1:1 + HO, 1:1 + WO, :] = z.reshape(HO, WO, CH)
    out_ref[0] = jnp.maximum(conv3x3(2) + y0, 0.0)


# ---------------------------------------------------------------------------
# Wrapper (jitted): transposes + im2col glue + one pallas_call
# ---------------------------------------------------------------------------
def _fused_forward(x_nchw, prep):
    x = jnp.transpose(x_nchw, (0, 2, 3, 1)).astype(jnp.bfloat16)   # -> NHWC, bf16
    N, H, W, cin = x.shape
    CH = prep['w3'].shape[-1]
    K1P = prep['wf'].shape[0]
    HO, WO = H // 2, W // 2
    HW = HO * WO

    # im2col for block0 conv1 (3x3, stride 2, pad 1) -- XLA glue, zero-padded K.
    xp = jnp.pad(x, ((0, 0), (1, 1), (1, 1), (0, 0)))
    taps = [xp[:, ky:ky + H:2, kx:kx + W:2, :]
            for ky in range(3) for kx in range(3)]
    p1 = jnp.concatenate(taps, axis=-1).reshape(N, HW, 9 * cin)
    p1 = jnp.pad(p1, ((0, 0), (0, 0), (0, K1P - 9 * cin)))          # (N, HW, K1P) bf16

    out = pl.pallas_call(
        fused_head_kernel,
        out_shape=jax.ShapeDtypeStruct((N, HW, CH), jnp.float32),
        grid=(N,),
        in_specs=[
            pl.BlockSpec((1, HW, K1P), lambda n: (n, 0, 0)),
            pl.BlockSpec((K1P, 2 * CH), lambda n: (0, 0)),
            pl.BlockSpec((1, 2 * CH), lambda n: (0, 0)),
            pl.BlockSpec((3, 9 * CH, CH), lambda n: (0, 0, 0)),
            pl.BlockSpec((3, 1, CH), lambda n: (0, 0, 0)),
        ],
        out_specs=pl.BlockSpec((1, HW, CH), lambda n: (n, 0, 0)),
        scratch_shapes=[pltpu.VMEM((HO + 2, WO + 2, CH), jnp.float32)],
        compiler_params=pltpu.CompilerParams(dimension_semantics=("parallel",)),
    )(p1, prep['wf'], prep['bf'], prep['w3'], prep['b3'])

    y = out.reshape(N, HO, WO, CH)
    return jnp.transpose(y, (0, 3, 1, 2))                          # -> NCHW


head_resnet_block_forward = jax.jit(_fused_forward)


# ---------------------------------------------------------------------------
# Pure-JAX f32 reference (lax.conv) for numerical verification
# ---------------------------------------------------------------------------
def _ref_forward(x_nchw, P):
    x = jnp.transpose(x_nchw, (0, 2, 3, 1)).astype(jnp.float32)

    def conv(x, w, stride):
        pad = w.shape[0] // 2
        return jax.lax.conv_general_dilated(
            x, w, (stride, stride), [(pad, pad), (pad, pad)],
            dimension_numbers=('NHWC', 'HWIO', 'NHWC'))

    def bn(x, g, b, m, v):
        return (x - m) / jnp.sqrt(v + EPS) * g + b

    y = jax.nn.relu(bn(conv(x, P['b0_w1'], 2), *P['b0_bn1']))
    y = bn(conv(y, P['b0_w2'], 1), *P['b0_bn2'])
    sc = bn(conv(x, P['b0_wd'], 2), *P['b0_bnd'])
    y0 = jax.nn.relu(y + sc)

    z = jax.nn.relu(bn(conv(y0, P['b1_w1'], 1), *P['b1_bn1']))
    z = bn(conv(z, P['b1_w2'], 1), *P['b1_bn2'])
    y1 = jax.nn.relu(z + y0)
    return jnp.transpose(y1, (0, 3, 1, 2))


if __name__ == "__main__":
    key = jax.random.PRNGKey(0)
    k_x, k_p = jax.random.split(key)

    N, Cin, H, W = 2, 4, 16, 16          # input image (NCHW, as in PyTorch)
    hidden = 32                           # num_hidden_filters

    x = jax.random.normal(k_x, (N, Cin, H, W), jnp.float32)
    P = make_params(k_p, Cin, hidden)
    prep = prepare_params(P)              # BN fold / pack / bf16 cast: done once

    out = jax.block_until_ready(head_resnet_block_forward(x, prep))
    ref = jax.block_until_ready(_ref_forward(x, P))

    assert out.shape == (N, hidden, H // 2, W // 2), out.shape
    # bf16 MXU inputs -> compare against the f32 reference with a looser tol.
    np.testing.assert_allclose(np.asarray(out), np.asarray(ref),
                               rtol=5e-2, atol=5e-2)

    print("KERNEL_OK")
</pallas_src>

<mosaic_0001>
module attributes {stable_mosaic.version = 11 : i64} {
  func.func @fused_head_kernel(%arg0: i32, %arg1: memref<1x64x128xbf16, #tpu.memory_space<vmem>>, %arg2: memref<128x64xbf16, #tpu.memory_space<vmem>>, %arg3: memref<1x64xf32, #tpu.memory_space<vmem>>, %arg4: memref<3x288x32xbf16, #tpu.memory_space<vmem>>, %arg5: memref<3x1x32xf32, #tpu.memory_space<vmem>>, %arg6: memref<1x64x32xf32, #tpu.memory_space<vmem>>, %arg7: memref<10x10x32xf32, #tpu.memory_space<vmem>>) attributes {dimension_semantics = [#tpu.dimension_semantics<parallel>], iteration_bounds = array<i64: 2>, scalar_prefetch = 0 : i64, scratch_operands = 1 : i64, tpu.core_type = #tpu.core_type<tc>, window_params = [{transform_indices = @transform_0, window_bounds = array<i64: 1, 64, 128>}, {pipeline_mode = #tpu.pipeline_mode<synchronous>, transform_indices = @transform_1, window_bounds = array<i64: 128, 64>}, {pipeline_mode = #tpu.pipeline_mode<synchronous>, transform_indices = @transform_2, window_bounds = array<i64: 1, 64>}, {pipeline_mode = #tpu.pipeline_mode<synchronous>, transform_indices = @transform_3, window_bounds = array<i64: 3, 288, 32>}, {pipeline_mode = #tpu.pipeline_mode<synchronous>, transform_indices = @transform_4, window_bounds = array<i64: 3, 1, 32>}, {transform_indices = @transform_5, window_bounds = array<i64: 1, 64, 32>}]} {
    %cst = arith.constant 0.000000e+00 : f32
    %0 = vector.broadcast %cst : f32 to vector<1x10x32xf32>
    %cst_0 = arith.constant 0.000000e+00 : f32
    %1 = vector.broadcast %cst_0 : f32 to vector<8x1x32xf32>
    %c0 = arith.constant 0 : index
    %c0_1 = arith.constant 0 : index
    %c0_2 = arith.constant 0 : index
    %2 = vector.load %arg7[%c0, %c0_1, %c0_2] : memref<10x10x32xf32, #tpu.memory_space<vmem>>, vector<1x10x32xf32>
    tpu.vector_store %arg7[%c0, %c0_1, %c0_2], %0 {strides = array<i32>} : memref<10x10x32xf32, #tpu.memory_space<vmem>>, vector<1x10x32xf32>,
    %c9 = arith.constant 9 : index
    %c0_3 = arith.constant 0 : index
    %c0_4 = arith.constant 0 : index
    %3 = vector.load %arg7[%c9, %c0_3, %c0_4] : memref<10x10x32xf32, #tpu.memory_space<vmem>>, vector<1x10x32xf32>
    tpu.vector_store %arg7[%c9, %c0_3, %c0_4], %0 {strides = array<i32>} : memref<10x10x32xf32, #tpu.memory_space<vmem>>, vector<1x10x32xf32>,
    %c1 = arith.constant 1 : index
    %c0_5 = arith.constant 0 : index
    %c0_6 = arith.constant 0 : index
    %4 = vector.load %arg7[%c1, %c0_5, %c0_6] : memref<10x10x32xf32, #tpu.memory_space<vmem>>, vector<8x1x32xf32>
    tpu.vector_store %arg7[%c1, %c0_5, %c0_6], %1 {strides = array<i32>} : memref<10x10x32xf32, #tpu.memory_space<vmem>>, vector<8x1x32xf32>,
    %c1_7 = arith.constant 1 : index
    %c9_8 = arith.constant 9 : index
    %c0_9 = arith.constant 0 : index
    %5 = vector.load %arg7[%c1_7, %c9_8, %c0_9] : memref<10x10x32xf32, #tpu.memory_space<vmem>>, vector<8x1x32xf32>
    tpu.vector_store %arg7[%c1_7, %c9_8, %c0_9], %1 {strides = array<i32>} : memref<10x10x32xf32, #tpu.memory_space<vmem>>, vector<8x1x32xf32>,
    %c0_10 = arith.constant 0 : index
    %c0_11 = arith.constant 0 : index
    %c0_12 = arith.constant 0 : index
    %6 = vector.load %arg1[%c0_10, %c0_11, %c0_12] : memref<1x64x128xbf16, #tpu.memory_space<vmem>>, vector<1x64x128xbf16>
    %7 = vector.shape_cast %6 : vector<1x64x128xbf16> to vector<64x128xbf16>
    %c0_13 = arith.constant 0 : index
    %c0_14 = arith.constant 0 : index
    %8 = vector.load %arg2[%c0_13, %c0_14] : memref<128x64xbf16, #tpu.memory_space<vmem>>, vector<128x64xbf16>
    %cst_15 = arith.constant dense<0.000000e+00> : vector<64x64xf32>
    %9 = tpu.matmul %7, %8, %cst_15 {dimension_numbers = #tpu.dot_dimension_numbers<[1], [0], [0], [1], [0, 0, 1, 1], [], []>} : vector<64x128xbf16>, vector<128x64xbf16>, vector<64x64xf32> -> vector<64x64xf32>
    %c0_16 = arith.constant 0 : index
    %c0_17 = arith.constant 0 : index
    %10 = vector.load %arg3[%c0_16, %c0_17] : memref<1x64xf32, #tpu.memory_space<vmem>>, vector<1x64xf32>
    %11 = vector.broadcast %10 : vector<1x64xf32> to vector<64x64xf32>
    %12 = arith.addf %9, %11 : vector<64x64xf32>
    %13 = vector.extract_strided_slice %12 {offsets = [0, 0], sizes = [64, 32], strides = [1, 1]} : vector<64x64xf32> to vector<64x32xf32>
    %cst_18 = arith.constant 0.000000e+00 : f32
    %14 = vector.broadcast %cst_18 : f32 to vector<64x32xf32>
    %15 = arith.maximumf %13, %14 : vector<64x32xf32>
    %16 = vector.extract_strided_slice %12 {offsets = [0, 32], sizes = [64, 32], strides = [1, 1]} : vector<64x64xf32> to vector<64x32xf32>
    %17 = vector.shape_cast %15 : vector<64x32xf32> to vector<8x8x32xf32>
    %c1_19 = arith.constant 1 : index
    %c1_20 = arith.constant 1 : index
    %c0_21 = arith.constant 0 : index
    %18 = vector.load %arg7[%c1_19, %c1_20, %c0_21] : memref<10x10x32xf32, #tpu.memory_space<vmem>>, vector<8x8x32xf32>
    tpu.vector_store %arg7[%c1_19, %c1_20, %c0_21], %17 {strides = array<i32>} : memref<10x10x32xf32, #tpu.memory_space<vmem>>, vector<8x8x32xf32>,
    %c0_22 = arith.constant 0 : index
    %c0_23 = arith.constant 0 : index
    %c0_24 = arith.constant 0 : index
    %19 = vector.load %arg7[%c0_22, %c0_23, %c0_24] : memref<10x10x32xf32, #tpu.memory_space<vmem>>, vector<10x10x32xf32>
    %20 = vector.extract_strided_slice %19 {offsets = [0, 0, 0], sizes = [8, 8, 32], strides = [1, 1, 1]} : vector<10x10x32xf32> to vector<8x8x32xf32>
    %21 = vector.shape_cast %20 : vector<8x8x32xf32> to vector<64x32xf32>
    %22 = vector.extract_strided_slice %19 {offsets = [0, 1, 0], sizes = [8, 8, 32], strides = [1, 1, 1]} : vector<10x10x32xf32> to vector<8x8x32xf32>
    %23 = vector.shape_cast %22 : vector<8x8x32xf32> to vector<64x32xf32>
    %24 = vector.extract_strided_slice %19 {offsets = [0, 2, 0], sizes = [8, 8, 32], strides = [1, 1, 1]} : vector<10x10x32xf32> to vector<8x8x32xf32>
    %25 = vector.shape_cast %24 : vector<8x8x32xf32> to vector<64x32xf32>
    %26 = vector.extract_strided_slice %19 {offsets = [1, 0, 0], sizes = [8, 8, 32], strides = [1, 1, 1]} : vector<10x10x32xf32> to vector<8x8x32xf32>
    %27 = vector.shape_cast %26 : vector<8x8x32xf32> to vector<64x32xf32>
    %28 = vector.extract_strided_slice %19 {offsets = [1, 1, 0], sizes = [8, 8, 32], strides = [1, 1, 1]} : vector<10x10x32xf32> to vector<8x8x32xf32>
    %29 = vector.shape_cast %28 : vector<8x8x32xf32> to vector<64x32xf32>
    %30 = vector.extract_strided_slice %19 {offsets = [1, 2, 0], sizes = [8, 8, 32], strides = [1, 1, 1]} : vector<10x10x32xf32> to vector<8x8x32xf32>
    %31 = vector.shape_cast %30 : vector<8x8x32xf32> to vector<64x32xf32>
    %32 = vector.extract_strided_slice %19 {offsets = [2, 0, 0], sizes = [8, 8, 32], strides = [1, 1, 1]} : vector<10x10x32xf32> to vector<8x8x32xf32>
    %33 = vector.shape_cast %32 : vector<8x8x32xf32> to vector<64x32xf32>
    %34 = vector.extract_strided_slice %19 {offsets = [2, 1, 0], sizes = [8, 8, 32], strides = [1, 1, 1]} : vector<10x10x32xf32> to vector<8x8x32xf32>
    %35 = vector.shape_cast %34 : vector<8x8x32xf32> to vector<64x32xf32>
    %36 = vector.extract_strided_slice %19 {offsets = [2, 2, 0], sizes = [8, 8, 32], strides = [1, 1, 1]} : vector<10x10x32xf32> to vector<8x8x32xf32>
    %37 = vector.shape_cast %36 : vector<8x8x32xf32> to vector<64x32xf32>
    %38 = tpu.concatenate %21, %23, %25, %27, %29, %31, %33, %35, %37 in 1 : vector<64x32xf32>, vector<64x32xf32>, vector<64x32xf32>, vector<64x32xf32>, vector<64x32xf32>, vector<64x32xf32>, vector<64x32xf32>, vector<64x32xf32>, vector<64x32xf32> -> vector<64x288xf32>
    %39 = arith.truncf %38 : vector<64x288xf32> to vector<64x288xbf16>
    %c0_25 = arith.constant 0 : index
    %c0_26 = arith.constant 0 : index
    %c0_27 = arith.constant 0 : index
    %40 = vector.load %arg4[%c0_25, %c0_26, %c0_27] : memref<3x288x32xbf16, #tpu.memory_space<vmem>>, vector<1x288x32xbf16>
    %41 = vector.shape_cast %40 : vector<1x288x32xbf16> to vector<288x32xbf16>
    %cst_28 = arith.constant dense<0.000000e+00> : vector<64x32xf32>
    %42 = tpu.matmul %39, %41, %cst_28 {dimension_numbers = #tpu.dot_dimension_numbers<[1], [0], [0], [1], [0, 0, 1, 1], [], []>} : vector<64x288xbf16>, vector<288x32xbf16>, vector<64x32xf32> -> vector<64x32xf32>
    %c0_29 = arith.constant 0 : index
    %c0_30 = arith.constant 0 : index
    %c0_31 = arith.constant 0 : index
    %43 = vector.load %arg5[%c0_29, %c0_30, %c0_31] : memref<3x1x32xf32, #tpu.memory_space<vmem>>, vector<1x1x32xf32>
    %44 = vector.shape_cast %43 : vector<1x1x32xf32> to vector<1x32xf32>
    %45 = vector.broadcast %44 : vector<1x32xf32> to vector<64x32xf32>
    %46 = arith.addf %42, %45 : vector<64x32xf32>
    %47 = arith.addf %46, %16 : vector<64x32xf32>
    %cst_32 = arith.constant 0.000000e+00 : f32
    %48 = vector.broadcast %cst_32 : f32 to vector<64x32xf32>
    %49 = arith.maximumf %47, %48 : vector<64x32xf32>
    %50 = vector.shape_cast %49 : vector<64x32xf32> to vector<8x8x32xf32>
    %c1_33 = arith.constant 1 : index
    %c1_34 = arith.constant 1 : index
    %c0_35 = arith.constant 0 : index
    %51 = vector.load %arg7[%c1_33, %c1_34, %c0_35] : memref<10x10x32xf32, #tpu.memory_space<vmem>>, vector<8x8x32xf32>
    tpu.vector_store %arg7[%c1_33, %c1_34, %c0_35], %50 {strides = array<i32>} : memref<10x10x32xf32, #tpu.memory_space<vmem>>, vector<8x8x32xf32>,
    %c0_36 = arith.constant 0 : index
    %c0_37 = arith.constant 0 : index
    %c0_38 = arith.constant 0 : index
    %52 = vector.load %arg7[%c0_36, %c0_37, %c0_38] : memref<10x10x32xf32, #tpu.memory_space<vmem>>, vector<10x10x32xf32>
    %53 = vector.extract_strided_slice %52 {offsets = [0, 0, 0], sizes = [8, 8, 32], strides = [1, 1, 1]} : vector<10x10x32xf32> to vector<8x8x32xf32>
    %54 = vector.shape_cast %53 : vector<8x8x32xf32> to vector<64x32xf32>
    %55 = vector.extract_strided_slice %52 {offsets = [0, 1, 0], sizes = [8, 8, 32], strides = [1, 1, 1]} : vector<10x10x32xf32> to vector<8x8x32xf32>
    %56 = vector.shape_cast %55 : vector<8x8x32xf32> to vector<64x32xf32>
    %57 = vector.extract_strided_slice %52 {offsets = [0, 2, 0], sizes = [8, 8, 32], strides = [1, 1, 1]} : vector<10x10x32xf32> to vector<8x8x32xf32>
    %58 = vector.shape_cast %57 : vector<8x8x32xf32> to vector<64x32xf32>
    %59 = vector.extract_strided_slice %52 {offsets = [1, 0, 0], sizes = [8, 8, 32], strides = [1, 1, 1]} : vector<10x10x32xf32> to vector<8x8x32xf32>
    %60 = vector.shape_cast %59 : vector<8x8x32xf32> to vector<64x32xf32>
    %61 = vector.extract_strided_slice %52 {offsets = [1, 1, 0], sizes = [8, 8, 32], strides = [1, 1, 1]} : vector<10x10x32xf32> to vector<8x8x32xf32>
    %62 = vector.shape_cast %61 : vector<8x8x32xf32> to vector<64x32xf32>
    %63 = vector.extract_strided_slice %52 {offsets = [1, 2, 0], sizes = [8, 8, 32], strides = [1, 1, 1]} : vector<10x10x32xf32> to vector<8x8x32xf32>
    %64 = vector.shape_cast %63 : vector<8x8x32xf32> to vector<64x32xf32>
    %65 = vector.extract_strided_slice %52 {offsets = [2, 0, 0], sizes = [8, 8, 32], strides = [1, 1, 1]} : vector<10x10x32xf32> to vector<8x8x32xf32>
    %66 = vector.shape_cast %65 : vector<8x8x32xf32> to vector<64x32xf32>
    %67 = vector.extract_strided_slice %52 {offsets = [2, 1, 0], sizes = [8, 8, 32], strides = [1, 1, 1]} : vector<10x10x32xf32> to vector<8x8x32xf32>
    %68 = vector.shape_cast %67 : vector<8x8x32xf32> to vector<64x32xf32>
    %69 = vector.extract_strided_slice %52 {offsets = [2, 2, 0], sizes = [8, 8, 32], strides = [1, 1, 1]} : vector<10x10x32xf32> to vector<8x8x32xf32>
    %70 = vector.shape_cast %69 : vector<8x8x32xf32> to vector<64x32xf32>
    %71 = tpu.concatenate %54, %56, %58, %60, %62, %64, %66, %68, %70 in 1 : vector<64x32xf32>, vector<64x32xf32>, vector<64x32xf32>, vector<64x32xf32>, vector<64x32xf32>, vector<64x32xf32>, vector<64x32xf32>, vector<64x32xf32>, vector<64x32xf32> -> vector<64x288xf32>
    %72 = arith.truncf %71 : vector<64x288xf32> to vector<64x288xbf16>
    %c1_39 = arith.constant 1 : index
    %c0_40 = arith.constant 0 : index
    %c0_41 = arith.constant 0 : index
    %73 = vector.load %arg4[%c1_39, %c0_40, %c0_41] : memref<3x288x32xbf16, #tpu.memory_space<vmem>>, vector<1x288x32xbf16>
    %74 = vector.shape_cast %73 : vector<1x288x32xbf16> to vector<288x32xbf16>
    %cst_42 = arith.constant dense<0.000000e+00> : vector<64x32xf32>
    %75 = tpu.matmul %72, %74, %cst_42 {dimension_numbers = #tpu.dot_dimension_numbers<[1], [0], [0], [1], [0, 0, 1, 1], [], []>} : vector<64x288xbf16>, vector<288x32xbf16>, vector<64x32xf32> -> vector<64x32xf32>
    %c1_43 = arith.constant 1 : index
    %c0_44 = arith.constant 0 : index
    %c0_45 = arith.constant 0 : index
    %76 = vector.load %arg5[%c1_43, %c0_44, %c0_45] : memref<3x1x32xf32, #tpu.memory_space<vmem>>, vector<1x1x32xf32>
    %77 = vector.shape_cast %76 : vector<1x1x32xf32> to vector<1x32xf32>
    %78 = vector.broadcast %77 : vector<1x32xf32> to vector<64x32xf32>
    %79 = arith.addf %75, %78 : vector<64x32xf32>
    %cst_46 = arith.constant 0.000000e+00 : f32
    %80 = vector.broadcast %cst_46 : f32 to vector<64x32xf32>
    %81 = arith.maximumf %79, %80 : vector<64x32xf32>
    %82 = vector.shape_cast %81 : vector<64x32xf32> to vector<8x8x32xf32>
    %c1_47 = arith.constant 1 : index
    %c1_48 = arith.constant 1 : index
    %c0_49 = arith.constant 0 : index
    %83 = vector.load %arg7[%c1_47, %c1_48, %c0_49] : memref<10x10x32xf32, #tpu.memory_space<vmem>>, vector<8x8x32xf32>
    tpu.vector_store %arg7[%c1_47, %c1_48, %c0_49], %82 {strides = array<i32>} : memref<10x10x32xf32, #tpu.memory_space<vmem>>, vector<8x8x32xf32>,
    %c0_50 = arith.constant 0 : index
    %c0_51 = arith.constant 0 : index
    %c0_52 = arith.constant 0 : index
    %84 = vector.load %arg7[%c0_50, %c0_51, %c0_52] : memref<10x10x32xf32, #tpu.memory_space<vmem>>, vector<10x10x32xf32>
    %85 = vector.extract_strided_slice %84 {offsets = [0, 0, 0], sizes = [8, 8, 32], strides = [1, 1, 1]} : vector<10x10x32xf32> to vector<8x8x32xf32>
    %86 = vector.shape_cast %85 : vector<8x8x32xf32> to vector<64x32xf32>
    %87 = vector.extract_strided_slice %84 {offsets = [0, 1, 0], sizes = [8, 8, 32], strides = [1, 1, 1]} : vector<10x10x32xf32> to vector<8x8x32xf32>
    %88 = vector.shape_cast %87 : vector<8x8x32xf32> to vector<64x32xf32>
    %89 = vector.extract_strided_slice %84 {offsets = [0, 2, 0], sizes = [8, 8, 32], strides = [1, 1, 1]} : vector<10x10x32xf32> to vector<8x8x32xf32>
    %90 = vector.shape_cast %89 : vector<8x8x32xf32> to vector<64x32xf32>
    %91 = vector.extract_strided_slice %84 {offsets = [1, 0, 0], sizes = [8, 8, 32], strides = [1, 1, 1]} : vector<10x10x32xf32> to vector<8x8x32xf32>
    %92 = vector.shape_cast %91 : vector<8x8x32xf32> to vector<64x32xf32>
    %93 = vector.extract_strided_slice %84 {offsets = [1, 1, 0], sizes = [8, 8, 32], strides = [1, 1, 1]} : vector<10x10x32xf32> to vector<8x8x32xf32>
    %94 = vector.shape_cast %93 : vector<8x8x32xf32> to vector<64x32xf32>
    %95 = vector.extract_strided_slice %84 {offsets = [1, 2, 0], sizes = [8, 8, 32], strides = [1, 1, 1]} : vector<10x10x32xf32> to vector<8x8x32xf32>
    %96 = vector.shape_cast %95 : vector<8x8x32xf32> to vector<64x32xf32>
    %97 = vector.extract_strided_slice %84 {offsets = [2, 0, 0], sizes = [8, 8, 32], strides = [1, 1, 1]} : vector<10x10x32xf32> to vector<8x8x32xf32>
    %98 = vector.shape_cast %97 : vector<8x8x32xf32> to vector<64x32xf32>
    %99 = vector.extract_strided_slice %84 {offsets = [2, 1, 0], sizes = [8, 8, 32], strides = [1, 1, 1]} : vector<10x10x32xf32> to vector<8x8x32xf32>
    %100 = vector.shape_cast %99 : vector<8x8x32xf32> to vector<64x32xf32>
    %101 = vector.extract_strided_slice %84 {offsets = [2, 2, 0], sizes = [8, 8, 32], strides = [1, 1, 1]} : vector<10x10x32xf32> to vector<8x8x32xf32>
    %102 = vector.shape_cast %101 : vector<8x8x32xf32> to vector<64x32xf32>
    %103 = tpu.concatenate %86, %88, %90, %92, %94, %96, %98, %100, %102 in 1 : vector<64x32xf32>, vector<64x32xf32>, vector<64x32xf32>, vector<64x32xf32>, vector<64x32xf32>, vector<64x32xf32>, vector<64x32xf32>, vector<64x32xf32>, vector<64x32xf32> -> vector<64x288xf32>
    %104 = arith.truncf %103 : vector<64x288xf32> to vector<64x288xbf16>
    %c2 = arith.constant 2 : index
    %c0_53 = arith.constant 0 : index
    %c0_54 = arith.constant 0 : index
    %105 = vector.load %arg4[%c2, %c0_53, %c0_54] : memref<3x288x32xbf16, #tpu.memory_space<vmem>>, vector<1x288x32xbf16>
    %106 = vector.shape_cast %105 : vector<1x288x32xbf16> to vector<288x32xbf16>
    %cst_55 = arith.constant dense<0.000000e+00> : vector<64x32xf32>
    %107 = tpu.matmul %104, %106, %cst_55 {dimension_numbers = #tpu.dot_dimension_numbers<[1], [0], [0], [1], [0, 0, 1, 1], [], []>} : vector<64x288xbf16>, vector<288x32xbf16>, vector<64x32xf32> -> vector<64x32xf32>
    %c2_56 = arith.constant 2 : index
    %c0_57 = arith.constant 0 : index
    %c0_58 = arith.constant 0 : index
    %108 = vector.load %arg5[%c2_56, %c0_57, %c0_58] : memref<3x1x32xf32, #tpu.memory_space<vmem>>, vector<1x1x32xf32>
    %109 = vector.shape_cast %108 : vector<1x1x32xf32> to vector<1x32xf32>
    %110 = vector.broadcast %109 : vector<1x32xf32> to vector<64x32xf32>
    %111 = arith.addf %107, %110 : vector<64x32xf32>
    %112 = arith.addf %111, %49 : vector<64x32xf32>
    %cst_59 = arith.constant 0.000000e+00 : f32
    %113 = vector.broadcast %cst_59 : f32 to vector<64x32xf32>
    %114 = arith.maximumf %112, %113 : vector<64x32xf32>
    %c0_60 = arith.constant 0 : index
    %c0_61 = arith.constant 0 : index
    %c0_62 = arith.constant 0 : index
    %115 = vector.load %arg6[%c0_60, %c0_61, %c0_62] : memref<1x64x32xf32, #tpu.memory_space<vmem>>, vector<1x64x32xf32>
    %116 = vector.shape_cast %115 : vector<1x64x32xf32> to vector<64x32xf32>
    %117 = vector.shape_cast %114 : vector<64x32xf32> to vector<1x64x32xf32>
    tpu.vector_store %arg6[%c0_60, %c0_61, %c0_62], %117 {strides = array<i32>} : memref<1x64x32xf32, #tpu.memory_space<vmem>>, vector<1x64x32xf32>,
    return
  }
  func.func @transform_0(%arg0: i32) -> (i32, i32, i32) {
    %c0_i32 = arith.constant 0 : i32
    %c0_i32_0 = arith.constant 0 : i32
    %c0_i32_1 = arith.constant 0 : i32
    return %arg0, %c0_i32, %c0_i32_0 : i32, i32, i32
  }
  func.func @transform_1(%arg0: i32) -> (i32, i32) {
    %c0_i32 = arith.constant 0 : i32
    %c0_i32_0 = arith.constant 0 : i32
    %c0_i32_1 = arith.constant 0 : i32
    return %c0_i32, %c0_i32_0 : i32, i32
  }
  func.func @transform_2(%arg0: i32) -> (i32, i32) {
    %c0_i32 = arith.constant 0 : i32
    %c0_i32_0 = arith.constant 0 : i32
    %c0_i32_1 = arith.constant 0 : i32
    return %c0_i32, %c0_i32_0 : i32, i32
  }
  func.func @transform_3(%arg0: i32) -> (i32, i32, i32) {
    %c0_i32 = arith.constant 0 : i32
    %c0_i32_0 = arith.constant 0 : i32
    %c0_i32_1 = arith.constant 0 : i32
    %c0_i32_2 = arith.constant 0 : i32
    return %c0_i32, %c0_i32_0, %c0_i32_1 : i32, i32, i32
  }
  func.func @transform_4(%arg0: i32) -> (i32, i32, i32) {
    %c0_i32 = arith.constant 0 : i32
    %c0_i32_0 = arith.constant 0 : i32
    %c0_i32_1 = arith.constant 0 : i32
    %c0_i32_2 = arith.constant 0 : i32
    return %c0_i32, %c0_i32_0, %c0_i32_1 : i32, i32, i32
  }
  func.func @transform_5(%arg0: i32) -> (i32, i32, i32) {
    %c0_i32 = arith.constant 0 : i32
    %c0_i32_0 = arith.constant 0 : i32
    %c0_i32_1 = arith.constant 0 : i32
    return %arg0, %c0_i32, %c0_i32_0 : i32, i32, i32
  }
}

</mosaic_0001>

<bundles_post_ra>
// kernel: _fused_forward.1
= control target key start
LH: loop header
LB: loop body
LE: loop exit
PB: predicated region body
PF: predicated region fallthrough
CT: control target
= control target key end

     0   :  { %10 = vsyncpa [#allocation4], 0  ;;  %s4347_s0 = inlined_call_operand.vmem [shape: bf16[2,64,128], index: 0, kind: input, shape index: {}]   ;;  %s4348_s1 = inlined_call_operand.vmem [shape: bf16[128,64], index: 1, kind: input, shape index: {}]   ;;  %s4349_s2 = inlined_call_operand.vmem [shape: f32[1,64], index: 2, kind: input, shape index: {}]   ;;  %s4350_s3 = inlined_call_operand.vmem [shape: bf16[3,288,32], index: 3, kind: input, shape index: {}]   ;;  %s4351_s4 = inlined_call_operand.vmem [shape: f32[3,1,32], index: 4, kind: input, shape index: {}]   ;;  %s4352_s5 = inlined_call_operand.hbm [shape: f32[2,64,32], index: 5, kind: output, shape index: {}]  }
   0x1   :  { %12 = vsyncpa [#allocation4 + $0x1], 0  ;;  %s3226_s18 = smov 0   ;;  %s3228_s19 = smov 0  }
   0x2   :  { %s3230_s20 = smov 0   ;;  %s3232_s21 = smov 0  }
   0x3 LB: > { %s3247_s22 = sadd.s32 4294967295, %s3188_s21   ;;  %s2277_s23 = sadd.s32 4294967294, %s3188_s21   ;;  %s3188_s21 = sphi %s3232_s21, %s4358_s21   ;;  %s3184_s20 = sphi %s3230_s20, %s4357_s20   ;;  %s3180_s19 = sphi %s3228_s19, %s4356_s19   ;;  %s3176_s18 = sphi %s3226_s18, %s4355_s18  }
   0x4   : > { %s3251_s24 = sadd.s32 1, %s3188_s21   ;;  %s135_s25 = sadd.s32 1, %s3184_s20 }
   0x5   : > { %s132_s26 = ssub.s32 %s3188_s21, %s3251_s24  ;;  %p145_p0 = scmp.ne.s32.totalorder %s3184_s20, %s3180_s19 }
   0x6   : > { %p133_p1 = scmp.eq.s32.totalorder %s132_s26, 0  ;;  %p146_p2 = scmp.eq.s32.totalorder %s3247_s22, 1 }
   0x7   : > { %p151_p3 = scmp.ne.s32.totalorder %s3180_s19, %s3176_s18  ;;  %p152_p4 = scmp.eq.s32.totalorder %s2277_s23, 1 }
   0x8   : > { %s3262_s27 = scalar_select %p133_p1, %s3184_s20, %s135_s25  }
   0x9   : > { %p3264_p5 = por %p146_p2, %p145_p0  ;;  %p3268_p6 = por %p152_p4, %p151_p3 }
   0xa   : > { %p2280_p7 = scmp.ge.s32.totalorder %s3188_s21, 1  ;;  %p190_p8 = scmp.lt.s32.totalorder %s3188_s21, 3 }
   0xc   : > { %p191_p9 = pnand %p2280_p7, %p190_p8 }
   0xd   : > { %p218_p10 = scmp.lt.s32.totalorder (!%p191_p9), %s3247_s22, 1  ;;  %s3191_s16 = smov (!%p191_p9), 32  }
   0xe   : > { %194 = sbr.rel (%p191_p9) target bundleno = 1165 (0x48d), region = 40  ;;  %s3193_s23 = smov (!%p191_p9), 64  }
   0xf   : > { %s2706_s6 = sshll.u32 (!%p191_p9), %s3247_s22, 6  ;;  %s3146_s14 = scalar_lea.hbm (!%p191_p9), %s4352_s5, 128 }
  0x13   : > { %v2651_v0 = vld [vmem:[%s4348_s1 + $0x38] sm:$0xff]  ;;  %v2650_v1 = vld [vmem:[%s4348_s1 + $0x30] sm:$0xff]  ;;  %v2649_v2 = vld [vmem:[%s4348_s1 + $0x28] sm:$0xff]  ;;  %s219_s17 = scalar_select %p218_p10, %s3247_s22, 1  ;;  %vm224_vm0 = vcmask 261120   ;;  %vm226_vm1 = vcmask 254976  }
  0x14   : > { %349 = vmatpush.bf16.msra.mxu0 %v2651_v0  ;;  %2707 = vmatpush.bf16.msra.mxu1 %v2651_v0  ;;  %v2648_v3 = vld [vmem:[%s4348_s1 + $0x20] sm:$0xff]  ;;  %v2647_v4 = vld [vmem:[%s4348_s1 + $0x18] sm:$0xff]  ;;  %v2646_v5 = vld [vmem:[%s4348_s1 + $0x10] sm:$0xff]  ;;  %vm232_vm2 = vcmask 253952   ;;  %v3190_v12 = vmov 0.0   ;;  %vm455_vm3 = vcmask 1045504  }
  0x15   : > { %v2645_v6 = vld [vmem:[%s4348_s1 + $0x8] sm:$0xff]  ;;  %s2639_s26 = sshll.u32 %s219_s17, 5  ;;  %v2644_v7 = vld [vmem:[%s4348_s1] sm:$0xff]  ;;  %225 = vst.msk [vmem:[#allocation2] sm:$0xff] %vm224_vm0, %v3190_v12  ;;  %vm430_vm4 = vcmask 1046528   ;;  %s3192_s17 = smov 96  }
  0x16   : > { %s222_s9 = scalar_lea.vmem %s4347_s0, %s2639_s26  ;;  %227 = vst.msk [vmem:[#allocation2 + $0x8] sm:$0x3] %vm226_vm1, %v3190_v12  ;;  %v3122_v13 = vld [vmem:[%s4349_s2] ss:$0 sm:$0xff]  ;;  %v3331_v18 = vld [vmem:[%s4350_s3 + $0x88] sm:$0xff]  ;;  %vm664_vm5 = vcmask 523264  }
  0x17   : > { %v2640_v8 = vld [vmem:[%s222_s9] sm:$0xff]  ;;  %v2642_v9 = vld [vmem:[%s222_s9 + $0x10] sm:$0xff]  ;;  %v2641_v10 = vld [vmem:[%s222_s9 + $0x8] sm:$0xff]  ;;  %233 = vst.msk [vmem:[#allocation2 + $0x10] sm:$0x1] %vm232_vm2, %v3190_v12  ;;  %2715 = vmatpush.bf16.msra.mxu3 %v3331_v18  ;;  %vm673_vm6 = vcmask 785408  }
  0x18   : > { %350 = vmatpush.bf16.msra.mxu0 %v2650_v1  ;;  %2708 = vmatpush.bf16.msra.mxu1 %v2650_v1  ;;  %v2643_v11 = vld [vmem:[%s222_s9 + $0x18] sm:$0xff]  ;;  %234 = vst.msk [vmem:[#allocation2 + $0x20] sm:$0x1] %vm232_vm2, %v3190_v12  ;;  %v3341_v21 = vld [vmem:[%s4350_s3 + $0x80] sm:$0xff]  ;;  %s215_s26 = sand.u32 1, %s3180_s19   ;;  %s2211_s9 = scalar_lea.hbm %s4352_s5, %s2706_s6 }
  0x19   : > { %235 = vst.msk [vmem:[#allocation2 + $0x30] sm:$0x1] %vm232_vm2, %v3190_v12  ;;  %s2281_s30 = sshll.u32 %s215_s26, 6  ;;  %s2200_s22 = scalar_lea.sflag [#allocation4], %s215_s26 }
  0x1a   : > { %241 = vst.msk [vmem:[#allocation2 + $0x19] sm:$0x1] %vm232_vm2, %v3190_v12 }
  0x1b   : > { %242 = vst.msk [vmem:[#allocation2 + $0x29] sm:$0x1] %vm232_vm2, %v3190_v12  ;;  %2716 = vmatpush.bf16.msra.mxu3 %v3341_v21 }
  0x1c   : > { %351 = vmatpush.bf16.msra.mxu0 %v2649_v2  ;;  %2709 = vmatpush.bf16.msra.mxu1 %v2649_v2  ;;  %243 = vst.msk [vmem:[#allocation2 + $0x39] sm:$0x1] %vm232_vm2, %v3190_v12 }
  0x1d   : > { %229 = vst.msk [vmem:[#allocation2 + $0x90] sm:$0xff] %vm224_vm0, %v3190_v12 }
  0x1e   : > { %230 = vst.msk [vmem:[#allocation2 + $0x98] sm:$0x3] %vm226_vm1, %v3190_v12 }
  0x1f   : > { %236 = vst.msk [vmem:[#allocation2 + $0x40] sm:$0x1] %vm232_vm2, %v3190_v12 }
  0x20   : > { %352 = vmatpush.bf16.msra.mxu0 %v2648_v3  ;;  %2710 = vmatpush.bf16.msra.mxu1 %v2648_v3  ;;  %237 = vst.msk [vmem:[#allocation2 + $0x50] sm:$0x1] %vm232_vm2, %v3190_v12 }
  0x21   : > { %238 = vst.msk [vmem:[#allocation2 + $0x60] sm:$0x1] %vm232_vm2, %v3190_v12 }
  0x22   : > { %239 = vst.msk [vmem:[#allocation2 + $0x70] sm:$0x1] %vm232_vm2, %v3190_v12 }
  0x23   : > { %240 = vst.msk [vmem:[#allocation2 + $0x80] sm:$0x1] %vm232_vm2, %v3190_v12 }
  0x24   : > { %353 = vmatpush.bf16.msra.mxu0 %v2647_v4  ;;  %2711 = vmatpush.bf16.msra.mxu1 %v2647_v4  ;;  %244 = vst.msk [vmem:[#allocation2 + $0x49] sm:$0x1] %vm232_vm2, %v3190_v12 }
  0x25   : > { %245 = vst.msk [vmem:[#allocation2 + $0x59] sm:$0x1] %vm232_vm2, %v3190_v12 }
  0x26   : > { %246 = vst.msk [vmem:[#allocation2 + $0x69] sm:$0x1] %vm232_vm2, %v3190_v12 }
  0x27   : > { %247 = vst.msk [vmem:[#allocation2 + $0x79] sm:$0x1] %vm232_vm2, %v3190_v12 }
  0x28   : > { %354 = vmatpush.bf16.msra.mxu0 %v2646_v5  ;;  %2712 = vmatpush.bf16.msra.mxu1 %v2646_v5  ;;  %248 = vst.msk [vmem:[#allocation2 + $0x89] sm:$0x1] %vm232_vm2, %v3190_v12 }
  0x2c   : > { %355 = vmatpush.bf16.msra.mxu0 %v2645_v6  ;;  %2713 = vmatpush.bf16.msra.mxu1 %v2645_v6 }
  0x30   : > { %356 = vmatpush.bf16.msra.mxu0 %v2644_v7  ;;  %2714 = vmatpush.bf16.msra.mxu1 %v2644_v7 }
  0x33   : > { %357 = vmatmul.bf16.vlgmr.msra.gmra.mxu0 %v2640_v8  ;;  %367 = vmatmul.bf16.vlgmr.msra.gmra.mxu1 %v2642_v9 }
  0x43   : > { %362 = vmatmul.bf16.gmra.mxu0 %v2641_v10  ;;  %372 = vmatmul.bf16.gmra.mxu1 %v2643_v11 }
  0xb0   : > { %v358_v14 = vpop.f32.mrf.mxu0  ;;  %v368_v15 = vpop.f32.mrf.mxu1 }
  0xb1   : > { %v3324_v16 = vadd.f32 %v3122_v13, %v358_v14  ;;  %v3326_v17 = vadd.f32 %v3122_v13, %v368_v15 }
  0xb3   : > { %v378_v19 = vmax.f32 %v3324_v16, 0.0  ;;  %v382_v20 = vmax.f32 %v3326_v17, 0.0 }
  0xb5   : > { %386 = vst.msk [vmem:[#allocation2 + $0x11] sm:$0xff] %vm224_vm0, %v378_v19 }
  0xb6   : > { %390 = vst.msk [vmem:[#allocation2 + $0x51] sm:$0xff] %vm224_vm0, %v382_v20 }
  0xb8   : > { %v360_v22 = vpop.f32.mrf.mxu0  ;;  %v370_v23 = vpop.f32.mrf.mxu1 }
  0xb9   : > { %v3343_v24 = vadd.f32 %v3122_v13, %v360_v22  ;;  %v3345_v25 = vadd.f32 %v3122_v13, %v370_v23 }
  0xbb   : > { %v379_v26 = vmax.f32 %v3343_v24, 0.0  ;;  %v383_v27 = vmax.f32 %v3345_v25, 0.0 }
  0xbc   : > { %v3352_v30 = vld [vmem:[#allocation2 + $0x10] sm:$0xff]  ;;  %v3354_v31 = vld [vmem:[#allocation2 + $0x18] sm:$0x3] }
  0xbd   : > { %387 = vst.msk [vmem:[#allocation2 + $0x21] sm:$0xff] %vm224_vm0, %v379_v26  ;;  %v459_v36 = vrot.slane %v3352_v30, 2  ;;  %v460_v37 = vrot.slane %v3354_v31, 2  ;;  %v3386_v51 = vld [vmem:[#allocation2 + $0x50] sm:$0xff]  ;;  %v405_v56 = vld [vmem:[#allocation2 + $0x58] sm:$0x3] }
  0xbe   : > { %391 = vst.msk [vmem:[#allocation2 + $0x61] sm:$0xff] %vm224_vm0, %v383_v27  ;;  %v471_v2 = vrot.slane %v3386_v51, 2  ;;  %v472_v3 = vrot.slane %v405_v56, 2 }
  0xbf   : > { %v3370_v42 = vsel %vm455_vm3, %v459_v36, %v460_v37 }
  0xc0   : > { %v363_v28 = vpop.f32.mrf.mxu0  ;;  %v373_v29 = vpop.f32.mrf.mxu1  ;;  %v3435_v19 = vsel %vm455_vm3, %v471_v2, %v472_v3  ;;  %v395_v2 = vld [vmem:[#allocation2 + $0x8] sm:$0x3] }
  0xc1   : > { %v3356_v32 = vadd.f32 %v3122_v13, %v363_v28  ;;  %v3358_v33 = vadd.f32 %v3122_v13, %v373_v29  ;;  %v446_v28 = vrot.slane %v3386_v51, 1 }
  0xc3   : > { %v380_v34 = vmax.f32 %v3356_v32, 0.0  ;;  %v384_v35 = vmax.f32 %v3358_v33, 0.0 }
  0xc4   : > { %v3364_v38 = vld [vmem:[#allocation2 + $0x20] sm:$0xff]  ;;  %v399_v39 = vld [vmem:[#allocation2 + $0x28] sm:$0x3] }
  0xc5   : > { %388 = vst.msk [vmem:[#allocation2 + $0x31] sm:$0xff] %vm224_vm0, %v380_v34  ;;  %v462_v40 = vrot.slane %v3364_v38, 2  ;;  %v463_v41 = vrot.slane %v399_v39, 2  ;;  %v3381_v49 = vld [vmem:[#allocation2 + $0x60] sm:$0xff]  ;;  %v3383_v50 = vld [vmem:[#allocation2 + $0x68] sm:$0x3] }
  0xc6   : > { %392 = vst.msk [vmem:[#allocation2 + $0x71] sm:$0xff] %vm224_vm0, %v384_v35  ;;  %v437_v54 = vrot.slane %v3364_v38, 1  ;;  %v438_v55 = vrot.slane %v399_v39, 1  ;;  %v474_v59 = vrot.slane %v3381_v49, 2  ;;  %v475_v60 = vrot.slane %v3383_v50, 2 }
  0xc7   : > { %v3373_v43 = vsel %vm455_vm3, %v462_v40, %v463_v41  ;;  %v447_v39 = vrot.slane %v405_v56, 1  ;;  %v3449_v40 = vld [vmem:[#allocation2 + $0x90] sm:$0xff]  ;;  %v413_v41 = vld [vmem:[#allocation2 + $0x98] sm:$0x3] }
  0xc8   : > { %v365_v44 = vpop.f32.mrf.mxu0  ;;  %v2762_v45 = vpack.i.bf16 %v3373_v43, %v3370_v42  ;;  %v375_v46 = vpop.f32.mrf.mxu1  ;;  %v3409_v7 = vsel %vm430_vm4, %v437_v54, %v438_v55  ;;  %v502_v54 = vrot.slane %v413_v41, 2 }
  0xc9   : > { %v3377_v47 = vadd.f32 %v3122_v13, %v365_v44  ;;  %v3379_v48 = vadd.f32 %v3122_v13, %v375_v46  ;;  %v3424_v13 = vsel %vm455_vm3, %v474_v59, %v475_v60  ;;  %v3465_v56 = vsel %vm430_vm4, %v446_v28, %v447_v39 }
  0xca   : > { %2763 = vrot.lane.b32.xlu0 %v2762_v45, %s3191_s16  ;;  %v2792_v35 = vpack.i.bf16 %v3424_v13, %v3435_v19 }
  0xcb   : > { %v381_v52 = vmax.f32 %v3377_v47, 0.0  ;;  %v385_v53 = vmax.f32 %v3379_v48, 0.0 }
  0xcc   : > { %v3391_v57 = vld [vmem:[#allocation2 + $0x30] sm:$0xff]  ;;  %v401_v58 = vld [vmem:[#allocation2 + $0x38] sm:$0x3] }
  0xcd   : > { %389 = vst.msk [vmem:[#allocation2 + $0x41] sm:$0xff] %vm224_vm0, %v381_v52  ;;  %v465_v61 = vrot.slane %v3391_v57, 2  ;;  %v466_v62 = vrot.slane %v401_v58, 2  ;;  %v440_v63 = vrot.slane %v3391_v57, 1  ;;  %v441_v0 = vrot.slane %v401_v58, 1  ;;  %v3398_v1 = vld [vmem:[#allocation2 + $0x70] sm:$0xff] }
  0xce   : > { %393 = vst.msk [vmem:[#allocation2 + $0x81] sm:$0xff] %vm224_vm0, %v385_v53  ;;  %v3402_v4 = vld [vmem:[#allocation2 + $0x78] sm:$0x3]  ;;  %v477_v5 = vrot.slane %v3398_v1, 2  ;;  %v2767_v12 = vpack.i.bf16 %v3391_v57, %v3364_v38  ;;  %v501_v53 = vrot.slane %v3449_v40, 2  ;;  %v2797_v3 = vpack.i.bf16 %v3398_v1, %v3381_v49 }
  0xcf   : > { %v3406_v6 = vsel %vm455_vm3, %v465_v61, %v466_v62  ;;  %v3412_v8 = vsel %vm430_vm4, %v440_v63, %v441_v0  ;;  %v478_v9 = vrot.slane %v3402_v4, 2  ;;  %v449_v61 = vrot.slane %v3381_v49, 1  ;;  %v3477_v0 = vld [vmem:[#allocation2] sm:$0xff] }
  0xd0   : > { %v708_v10 = vpack.c.bf16 %v3406_v6, %v3373_v43  ;;  %v3419_v11 = vpack.i.bf16 %v3412_v8, %v3409_v7  ;;  %v450_v62 = vrot.slane %v3383_v50, 1  ;;  %v503_v63 = vsel %vm455_vm3, %v501_v53, %v502_v54 }
  0xd1   : > { %v3427_v14 = vsel %vm455_vm3, %v477_v5, %v478_v9  ;;  %v452_v9 = vrot.slane %v3398_v1, 1  ;;  %v431_v50 = vrot.slane %v3477_v0, 1  ;;  %v456_v54 = vrot.slane %v3477_v0, 2 }
  0xd2   : > { %2773 = vrot.lane.b32.xlu1 %v3419_v11, %s3192_s17  ;;  %2768 = vrot.lane.b32.xlu0 %v2767_v12, %s3193_s23  ;;  %v714_v15 = vpack.c.bf16 %v3427_v14, %v3424_v13  ;;  %v453_v12 = vrot.slane %v3402_v4, 1  ;;  %v498_v4 = vrot.slane %v3449_v40, 1 }
  0xd4   : > { %v3437_v20 = vld [vmem:[#allocation2 + $0x40] sm:$0xff]  ;;  %v403_v22 = vld [vmem:[#allocation2 + $0x48] sm:$0x3]  ;;  %2406 = vmatmul.msk.bf16.vlgmr.msra.gmra.mxu3 %vm224_vm0, %v714_v15  ;;  %v3494_v28 = vsel %vm430_vm4, %v452_v9, %v453_v12  ;;  %v2862_v9 = vpack.i.bf16 %v3381_v49, %v3386_v51  ;;  %v2872_v12 = vpack.i.bf16 %v3427_v14, %v3424_v13 }
  0xd5   : > { %v2782_v23 = vpack.i.bf16 %v3386_v51, %v3437_v20  ;;  %v468_v26 = vrot.slane %v3437_v20, 2  ;;  %v469_v27 = vrot.slane %v403_v22, 2  ;;  %v3444_v29 = vld [vmem:[#allocation2 + $0x80] sm:$0xff]  ;;  %v411_v34 = vld [vmem:[#allocation2 + $0x88] sm:$0x3]  ;;  %v443_v36 = vrot.slane %v3437_v20, 1 }
  0xd6   : > { %v444_v37 = vrot.slane %v403_v22, 1  ;;  %v493_v45 = vrot.slane %v3444_v29, 2  ;;  %v494_v46 = vrot.slane %v411_v34, 2  ;;  %v432_v22 = vrot.slane %v395_v2, 1  ;;  %v2665_v13 = vld [vmem:[%s4350_s3 + $0x68] sm:$0xff] }
  0xd7   : > { %2783 = vrot.lane.b32.xlu2 %v2782_v23, %s3193_s23  ;;  %v3453_v44 = vsel %vm455_vm3, %v468_v26, %v469_v27  ;;  %v434_v23 = vrot.slane %v3352_v30, 1  ;;  %v435_v26 = vrot.slane %v3354_v31, 1  ;;  %v3491_v27 = vsel %vm430_vm4, %v449_v61, %v450_v62 }
  0xd8   : > { %v2777_v52 = vpack.i.bf16 %v3453_v44, %v3406_v6  ;;  %v3462_v55 = vsel %vm430_vm4, %v443_v36, %v444_v37  ;;  %v495_v58 = vsel %vm455_vm3, %v493_v45, %v494_v46  ;;  %v711_v59 = vpack.c.bf16 %v3435_v19, %v3453_v44 }
  0xd9   : > { %v2787_v60 = vpack.i.bf16 %v3465_v56, %v3462_v55  ;;  %v2807_v5 = vpack.i.bf16 %v495_v58, %v3427_v14  ;;  %v717_v15 = vpack.c.bf16 %v503_v63, %v495_v58  ;;  %v483_v36 = vrot.slane %v411_v34, 1 }
  0xda   : > { %2778 = vrot.lane.b32.xlu1 %v2777_v52, %s3191_s16  ;;  %2793 = vrot.lane.b32.xlu0 %v2792_v35, %s3191_s16  ;;  %v482_v35 = vrot.slane %v3444_v29, 1  ;;  %v499_v37 = vrot.slane %v413_v41, 1  ;;  %v2802_v31 = vpack.i.bf16 %v3494_v28, %v3491_v27  ;;  %v433_v39 = vsel %vm430_vm4, %v431_v50, %v432_v22  ;;  %v2654_v22 = vld [vmem:[%s4350_s3 + $0x10] sm:$0xff] }
  0xdb   : > { %v3505_v45 = vsel %vm430_vm4, %v434_v23, %v435_v26  ;;  %v2812_v46 = vpack.i.bf16 %v3449_v40, %v3444_v29  ;;  %v457_v58 = vrot.slane %v395_v2, 2  ;;  %v2832_v2 = vpack.i.bf16 %v3364_v38, %v3352_v30 }
  0xdc   : > { %v2822_v52 = vpack.i.bf16 %v3505_v45, %v433_v39  ;;  %v3512_v34 = vsel %vm430_vm4, %v482_v35, %v483_v36  ;;  %v500_v41 = vsel %vm430_vm4, %v498_v4, %v499_v37  ;;  %v2653_v35 = vld [vmem:[%s4350_s3 + $0x8] sm:$0xff] }
  0xdd   : > { %v2817_v61 = vpack.i.bf16 %v500_v41, %v3512_v34  ;;  %v458_v62 = vsel %vm455_vm3, %v456_v54, %v457_v58 }
  0xde   : > { %v2827_v63 = vpack.i.bf16 %v3370_v42, %v458_v62  ;;  %v2847_v42 = vpack.i.bf16 %v3437_v20, %v3391_v57 }
  0xdf   : > { %2788 = vrot.lane.b32.xlu2 %v2787_v60, %s3192_s17 }
  0xe2   : > { %2798 = vrot.lane.b32.xlu1 %v2797_v3, %s3193_s23  ;;  %2808 = vrot.lane.b32.xlu0 %v2807_v5, %s3191_s16  ;;  %v2842_v3 = vpack.i.bf16 %v3406_v6, %v3373_v43  ;;  %v2667_v5 = vld [vmem:[%s4350_s3 + $0x78] sm:$0xff] }
  0xe3   : > { %907 = vmatpush.bf16.msra.mxu2 %v2667_v5 }
  0xe4   : > { %2407 = vmatmul.msk.bf16.gmra.mxu3 %vm224_vm0, %v717_v15  ;;  %v2877_v15 = vpack.i.bf16 %v3444_v29, %v3398_v1 }
  0xe7   : > { %2803 = vrot.lane.b32.xlu2 %v2802_v31, %s3192_s17 }
  0xea   : > { %2813 = vrot.lane.b32.xlu1 %v2812_v46, %s3193_s23  ;;  %2823 = vrot.lane.b32.xlu0 %v2822_v52, %s3191_s16 }
  0xef   : > { %2818 = vrot.lane.b32.xlu2 %v2817_v61, %s3192_s17 }
  0xf2   : > { %2828 = vrot.lane.b32.xlu1 %v2827_v63, %s3193_s23  ;;  %2838 = vrot.lane.b32.xlu0 %v3419_v11, %s3191_s16  ;;  %v2857_v11 = vpack.i.bf16 %v3435_v19, %v3453_v44  ;;  %v3701_v19 = vld [vmem:[%s4351_s4] ss:$0 sm:$0xff] }
  0xf7   : > { %2833 = vrot.lane.b32.xlu2 %v2832_v2, %s3192_s17  ;;  %v2652_v2 = vld [vmem:[%s4350_s3] sm:$0xff] }
  0xfa   : > { %2843 = vrot.lane.b32.xlu1 %v2842_v3, %s3193_s23  ;;  %2853 = vrot.lane.b32.xlu0 %v2787_v60, %s3191_s16  ;;  %v2666_v60 = vld [vmem:[%s4350_s3 + $0x70] sm:$0xff] }
  0xfb   : > { %908 = vmatpush.bf16.msra.mxu2 %v2666_v60 }
  0xff   : > { %2848 = vrot.lane.b32.xlu2 %v2847_v42, %s3192_s17  ;;  %909 = vmatpush.bf16.msra.mxu2 %v2665_v13 }
 0x102   : > { %2858 = vrot.lane.b32.xlu1 %v2857_v11, %s3193_s23  ;;  %2868 = vrot.lane.b32.xlu0 %v2802_v31, %s3191_s16 }
 0x107   : > { %2863 = vrot.lane.b32.xlu2 %v2862_v9, %s3192_s17 }
 0x10a   : > { %2873 = vrot.lane.b32.xlu1 %v2872_v12, %s3193_s23  ;;  %973 = vrot.lane.b32.xlu0 %v3324_v16, %s3192_s17  ;;  %v2664_v16 = vld [vmem:[%s4350_s3 + $0x60] sm:$0xff] }
 0x10b   : > { %910 = vmatpush.bf16.msra.mxu2 %v2664_v16 }
 0x10f   : > { %2878 = vrot.lane.b32.xlu2 %v2877_v15, %s3192_s17 }
 0x112   : > { %975 = vrot.lane.b32.xlu1 %v3343_v24, %s3192_s17  ;;  %979 = vrot.lane.b32.xlu0 %v3377_v47, %s3192_s17  ;;  %v2663_v24 = vld [vmem:[%s4350_s3 + $0x58] sm:$0xff]  ;;  %v2662_v47 = vld [vmem:[%s4350_s3 + $0x50] sm:$0xff] }
 0x113   : > { %911 = vmatpush.bf16.msra.mxu2 %v2663_v24 }
 0x117   : > { %977 = vrot.lane.b32.xlu2 %v3356_v32, %s3192_s17  ;;  %912 = vmatpush.bf16.msra.mxu2 %v2662_v47  ;;  %v2660_v32 = vld [vmem:[%s4350_s3 + $0x40] sm:$0xff] }
 0x11a   : > { %981 = vrot.lane.b32.xlu1 %v3326_v17, %s3192_s17  ;;  %985 = vrot.lane.b32.xlu0 %v3358_v33, %s3192_s17  ;;  %v2661_v17 = vld [vmem:[%s4350_s3 + $0x48] sm:$0xff]  ;;  %v2658_v33 = vld [vmem:[%s4350_s3 + $0x30] sm:$0xff] }
 0x11b   : > { %913 = vmatpush.bf16.msra.mxu2 %v2661_v17 }
 0x11f   : > { %983 = vrot.lane.b32.xlu2 %v3345_v25, %s3192_s17  ;;  %914 = vmatpush.bf16.msra.mxu2 %v2660_v32  ;;  %v2659_v25 = vld [vmem:[%s4350_s3 + $0x38] sm:$0xff] }
 0x120   : > { %878 = vmatpush.bf16.msrb.mxu1 %v2659_v25 }
 0x122   : > { %987 = vrot.lane.b32.xlu1 %v3379_v48, %s3192_s17  ;;  %v2657_v48 = vld [vmem:[%s4350_s3 + $0x28] sm:$0xff] }
 0x123   : > { %942 = vmatpush.bf16.msrb.mxu2 %v3331_v18  ;;  %v2656_v18 = vld [vmem:[%s4350_s3 + $0x20] sm:$0xff] }
 0x124   : > { %879 = vmatpush.bf16.msrb.mxu1 %v2658_v33 }
 0x127   : > { %943 = vmatpush.bf16.msrb.mxu2 %v3341_v21  ;;  %v2655_v21 = vld [vmem:[%s4350_s3 + $0x18] sm:$0xff] }
 0x128   : > { %880 = vmatpush.bf16.msrb.mxu1 %v2657_v48 }
 0x12c   : > { %881 = vmatpush.bf16.msrb.mxu1 %v2656_v18 }
 0x130   : > { %882 = vmatpush.bf16.msrb.mxu1 %v2655_v21 }
 0x131   : > { %v2784_v14 = vpop.permute.xlu2 %2783 }
 0x132   : > { %v2786_v13 = vunpack.i.h.bf16 %v2784_v14  ;;  %v2785_v16 = vunpack.i.l.bf16 %v2784_v14 }
 0x134   : > { %883 = vmatpush.bf16.msrb.mxu1 %v2654_v22 }
 0x138   : > { %884 = vmatpush.bf16.msrb.mxu1 %v2653_v35 }
 0x139   : > { %v2789_v36 = vpop.permute.xlu2 %2788 }
 0x13a   : > { %v2791_v17 = vunpack.i.h.bf16 %v2789_v36  ;;  %v2790_v32 = vunpack.i.l.bf16 %v2789_v36 }
 0x13c   : > { %v2764_v29 = vpop.permute.xlu0 %2763  ;;  %885 = vmatpush.bf16.msrb.mxu1 %v2652_v2 }
 0x13d   : > { %v2766_v23 = vunpack.i.h.bf16 %v2764_v29  ;;  %v2765_v26 = vunpack.i.l.bf16 %v2764_v29 }
 0x13f   : > { %v683_v58 = vsel %vm224_vm0, %v3409_v7, %v2766_v23  ;;  %v682_v61 = vsel %vm224_vm0, %v3505_v45, %v2765_v26 }
 0x141   : > { %v2804_v45 = vpop.permute.xlu2 %2803 }
 0x144   : > { %v2774_v37 = vpop.permute.xlu1 %2773  ;;  %v2769_v31 = vpop.permute.xlu0 %2768 }
 0x145   : > { %v2776_v39 = vunpack.i.h.bf16 %v2774_v37  ;;  %v2775_v46 = vunpack.i.l.bf16 %v2774_v37  ;;  %v2771_v52 = vunpack.i.h.bf16 %v2769_v31  ;;  %v2770_v41 = vunpack.i.l.bf16 %v2769_v31 }
 0x147   : > { %v690_v62 = vsel %vm664_vm5, %v682_v61, %v2770_v41  ;;  %v691_v63 = vsel %vm664_vm5, %v683_v58, %v2771_v52  ;;  %v2806_v41 = vunpack.i.h.bf16 %v2804_v45  ;;  %v2805_v58 = vunpack.i.l.bf16 %v2804_v45 }
 0x148   : > { %v698_v3 = vsel %vm673_vm6, %v690_v62, %v2775_v46  ;;  %v699_v42 = vsel %vm673_vm6, %v691_v63, %v2776_v39 }
 0x149   : > { %v707_v11 = vpack.c.bf16 %v699_v42, %v698_v3  ;;  %v3634_v21 = vpop.permute.xlu2 %2818 }
 0x14b   : > { %915 = vmatmul.bf16.vlgmr.msra.gmra.mxu2 %v707_v11 }
 0x14c   : > { %v2779_v5 = vpop.permute.xlu1 %2778  ;;  %v2794_v7 = vpop.permute.xlu0 %2793 }
 0x14d   : > { %v2781_v60 = vunpack.i.h.bf16 %v2779_v5  ;;  %v2780_v9 = vunpack.i.l.bf16 %v2779_v5  ;;  %v2795_v22 = vunpack.i.l.bf16 %v2794_v7 }
 0x14f   : > { %v685_v12 = vsel %vm224_vm0, %v3462_v55, %v2781_v60  ;;  %v684_v15 = vsel %vm224_vm0, %v3412_v8, %v2780_v9  ;;  %v2796_v8 = vunpack.i.h.bf16 %v2794_v7  ;;  %v686_v36 = vsel %vm224_vm0, %v3465_v56, %v2795_v22 }
 0x150   : > { %v692_v24 = vsel %vm664_vm5, %v684_v15, %v2785_v16  ;;  %v693_v47 = vsel %vm664_vm5, %v685_v12, %v2786_v13 }
 0x151   : > { %v700_v48 = vsel %vm673_vm6, %v692_v24, %v2790_v32  ;;  %v701_v18 = vsel %vm673_vm6, %v693_v47, %v2791_v17  ;;  %v687_v35 = vsel %vm224_vm0, %v3491_v27, %v2796_v8  ;;  %v2834_v37 = vpop.permute.xlu2 %2833 }
 0x152   : > { %v710_v55 = vpack.c.bf16 %v701_v18, %v700_v48  ;;  %v2836_v62 = vunpack.i.h.bf16 %v2834_v37  ;;  %v2835_v63 = vunpack.i.l.bf16 %v2834_v37 }
 0x154   : > { %v2799_v25 = vpop.permute.xlu1 %2798  ;;  %v2809_v33 = vpop.permute.xlu0 %2808 }
 0x155   : > { %v2801_v14 = vunpack.i.h.bf16 %v2799_v25  ;;  %v2800_v23 = vunpack.i.l.bf16 %v2799_v25  ;;  %v2811_v13 = vunpack.i.h.bf16 %v2809_v33  ;;  %v2810_v16 = vunpack.i.l.bf16 %v2809_v33 }
 0x157   : > { %v694_v46 = vsel %vm664_vm5, %v686_v36, %v2800_v23  ;;  %v695_v52 = vsel %vm664_vm5, %v687_v35, %v2801_v14  ;;  %v688_v8 = vsel %vm224_vm0, %v3494_v28, %v2810_v16  ;;  %v2821_v35 = vunpack.i.h.bf16 %v3634_v21  ;;  %v955_v44 = vpop.f32.mrf.mxu3 }
 0x158   : > { %v702_v42 = vsel %vm673_vm6, %v694_v46, %v2805_v58  ;;  %v703_v11 = vsel %vm673_vm6, %v695_v52, %v2806_v41 }
 0x159   : > { %v713_v12 = vpack.c.bf16 %v703_v11, %v702_v42  ;;  %v2849_v18 = vpop.permute.xlu2 %2848 }
 0x15a   : > { %v2851_v36 = vunpack.i.h.bf16 %v2849_v18  ;;  %v2850_v28 = vunpack.i.l.bf16 %v2849_v18 }
 0x15b   : > { %920 = vmatmul.bf16.gmra.mxu2 %v710_v55  ;;  %v689_v55 = vsel %vm224_vm0, %v3512_v34, %v2811_v13  ;;  %v2820_v34 = vunpack.i.l.bf16 %v3634_v21 }
 0x15c   : > { %v2814_v29 = vpop.permute.xlu1 %2813  ;;  %v2824_v26 = vpop.permute.xlu0 %2823 }
 0x15d   : > { %v2826_v31 = vunpack.i.h.bf16 %v2824_v26  ;;  %v2825_v39 = vunpack.i.l.bf16 %v2824_v26  ;;  %v2816_v17 = vunpack.i.h.bf16 %v2814_v29  ;;  %v2815_v32 = vunpack.i.l.bf16 %v2814_v29 }
 0x15f   : > { %v657_v27 = vsel %vm224_vm0, %v3352_v30, %v2826_v31  ;;  %v656_v56 = vsel %vm224_vm0, %v3477_v0, %v2825_v39  ;;  %v696_v29 = vsel %vm664_vm5, %v688_v8, %v2815_v32  ;;  %v697_v26 = vsel %vm664_vm5, %v689_v55, %v2816_v17 }
 0x160   : > { %v705_v31 = vsel %vm673_vm6, %v697_v26, %v2821_v35 }
 0x164   : > { %v2829_v61 = vpop.permute.xlu1 %2828  ;;  %v2839_v15 = vpop.permute.xlu0 %2838 }
 0x165   : > { %v2831_v2 = vunpack.i.h.bf16 %v2829_v61  ;;  %v2830_v3 = vunpack.i.l.bf16 %v2829_v61  ;;  %v2841_v24 = vunpack.i.h.bf16 %v2839_v15  ;;  %v2840_v47 = vunpack.i.l.bf16 %v2839_v15 }
 0x167   : > { %v665_v5 = vsel %vm664_vm5, %v656_v56, %v2830_v3  ;;  %v666_v7 = vsel %vm664_vm5, %v657_v27, %v2831_v2  ;;  %v659_v22 = vsel %vm224_vm0, %v3391_v57, %v2841_v24  ;;  %v658_v14 = vsel %vm224_vm0, %v3364_v38, %v2840_v47 }
 0x168   : > { %v674_v60 = vsel %vm673_vm6, %v665_v5, %v2835_v63  ;;  %v675_v9 = vsel %vm673_vm6, %v666_v7, %v2836_v62  ;;  %v704_v38 = vsel %vm673_vm6, %v696_v29, %v2820_v34  ;;  %v2864_v63 = vpop.permute.xlu2 %2863 }
 0x169   : > { %v706_v45 = vpack.c.bf16 %v675_v9, %v674_v60  ;;  %v716_v46 = vpack.c.bf16 %v705_v31, %v704_v38  ;;  %v2866_v42 = vunpack.i.h.bf16 %v2864_v63  ;;  %v2865_v11 = vunpack.i.l.bf16 %v2864_v63 }
 0x16b   : > { %886 = vmatmul.bf16.vlgmr.msrb.gmra.mxu1 %v706_v45  ;;  %925 = vmatmul.bf16.gmra.mxu2 %v713_v12 }
 0x16c   : > { %v2844_v30 = vpop.permute.xlu1 %2843  ;;  %v2854_v52 = vpop.permute.xlu0 %2853 }
 0x16d   : > { %v2846_v25 = vunpack.i.h.bf16 %v2844_v30  ;;  %v2845_v48 = vunpack.i.l.bf16 %v2844_v30  ;;  %v2856_v58 = vunpack.i.h.bf16 %v2854_v52  ;;  %v2855_v61 = vunpack.i.l.bf16 %v2854_v52 }
 0x16f   : > { %v667_v33 = vsel %vm664_vm5, %v658_v14, %v2845_v48  ;;  %v668_v23 = vsel %vm664_vm5, %v659_v22, %v2846_v25  ;;  %v661_v2 = vsel %vm224_vm0, %v3386_v51, %v2856_v58  ;;  %v660_v3 = vsel %vm224_vm0, %v3437_v20, %v2855_v61  ;;  %v957_v58 = vpop.f32.mrf.mxu3 }
 0x170   : > { %v676_v37 = vsel %vm673_vm6, %v667_v33, %v2850_v28  ;;  %v677_v57 = vsel %vm673_vm6, %v668_v23, %v2851_v36  ;;  %v2879_v30 = vpop.permute.xlu2 %2878 }
 0x171   : > { %v709_v39 = vpack.c.bf16 %v677_v57, %v676_v37  ;;  %v2881_v17 = vunpack.i.h.bf16 %v2879_v30  ;;  %v2880_v43 = vunpack.i.l.bf16 %v2879_v30  ;;  %v2687_v57 = vld [vmem:[%s4350_s3 + $0x118] sm:$0xff] }
 0x172   : > { %1567 = vmatpush.bf16.msra.mxu1 %v2687_v57 }
 0x174   : > { %v2859_v41 = vpop.permute.xlu1 %2858  ;;  %v2869_v9 = vpop.permute.xlu0 %2868 }
 0x175   : > { %v2861_v62 = vunpack.i.h.bf16 %v2859_v41  ;;  %v2860_v21 = vunpack.i.l.bf16 %v2859_v41  ;;  %v2871_v20 = vunpack.i.h.bf16 %v2869_v9  ;;  %v2870_v45 = vunpack.i.l.bf16 %v2869_v9 }
 0x177   : > { %v669_v27 = vsel %vm664_vm5, %v660_v3, %v2860_v21  ;;  %v670_v56 = vsel %vm664_vm5, %v661_v2, %v2861_v62  ;;  %v663_v13 = vsel %vm224_vm0, %v3398_v1, %v2871_v20  ;;  %v662_v16 = vsel %vm224_vm0, %v3381_v49, %v2870_v45  ;;  %v2686_v62 = vld [vmem:[%s4350_s3 + $0x110] sm:$0xff] }
 0x178   : > { %v678_v5 = vsel %vm673_vm6, %v669_v27, %v2865_v11  ;;  %v679_v7 = vsel %vm673_vm6, %v670_v56, %v2866_v42  ;;  %v978_v37 = vpop.permute.xlu2 %977  ;;  %1568 = vmatpush.bf16.msra.mxu1 %v2686_v62 }
 0x179   : > { %v712_v60 = vpack.c.bf16 %v679_v7, %v678_v5  ;;  %v1022_v7 = vld [vmem:[#allocation2 + $0x8] sm:$0x3] }
 0x17b   : > { %891 = vmatmul.bf16.gmra.mxu1 %v709_v39  ;;  %930 = vmatmul.bf16.gmra.mxu2 %v716_v46 }
 0x17c   : > { %v2874_v51 = vpop.permute.xlu1 %2873  ;;  %v974_v36 = vpop.permute.xlu0 %973 }
 0x17d   : > { %v2876_v12 = vunpack.i.h.bf16 %v2874_v51  ;;  %v2875_v15 = vunpack.i.l.bf16 %v2874_v51 }
 0x17f   : > { %v671_v24 = vsel %vm664_vm5, %v662_v16, %v2875_v15  ;;  %v672_v47 = vsel %vm664_vm5, %v663_v13, %v2876_v12  ;;  %v1082_v15 = vrot.slane %v1022_v7, 2 }
 0x180   : > { %v680_v6 = vsel %vm673_vm6, %v671_v24, %v2880_v43  ;;  %v960_v24 = vpop.f32.mrf.mxu3 }
 0x184   : > { %v976_v29 = vpop.permute.xlu1 %975  ;;  %v3724_v42 = vpop.permute.xlu0 %979 }
 0x18b   : > { %896 = vmatmul.bf16.gmra.mxu1 %v712_v60  ;;  %2404 = vmatmul.msk.bf16.vlgmr.msrb.gmra.mxu2 %vm224_vm0, %v708_v10  ;;  %v681_v10 = vsel %vm673_vm6, %v672_v47, %v2881_v17  ;;  %v984_v60 = vpop.permute.xlu2 %983  ;;  %v1058_v47 = vrot.slane %v1022_v7, 1 }
 0x18c   : > { %v715_v32 = vpack.c.bf16 %v681_v10, %v680_v6  ;;  %v982_v39 = vpop.permute.xlu1 %981 }
 0x19b   : > { %901 = vmatmul.bf16.gmra.mxu1 %v715_v32  ;;  %2405 = vmatmul.msk.bf16.gmra.mxu2 %vm224_vm0, %v711_v59 }
 0x1ce   : > { %v916_v1 = vpop.f32.mrf.mxu2 }
 0x1d6   : > { %v918_v25 = vpop.f32.mrf.mxu2 }
 0x1de   : > { %v921_v49 = vpop.f32.mrf.mxu2 }
 0x1e6   : > { %v3694_v48 = vpop.f32.mrf.mxu2 }
 0x1e8   : > { %v887_v18 = vpop.f32.mrf.mxu1 }
 0x1e9   : > { %v888_v35 = vadd.f32 %v3701_v19, %v887_v18 }
 0x1eb   : > { %v917_v31 = vadd.f32 %v916_v1, %v888_v35  ;;  %v1083_v1 = vsel %vm455_vm3, %v456_v54, %v1082_v15 }
 0x1ee   : > { %v926_v55 = vpop.f32.mrf.mxu2 }
 0x1f0   : > { %v889_v8 = vpop.f32.mrf.mxu1 }
 0x1f1   : > { %v890_v21 = vadd.f32 %v3701_v19, %v889_v8 }
 0x1f3   : > { %v919_v5 = vadd.f32 %v918_v25, %v890_v21 }
 0x1f6   : > { %v928_v22 = vpop.f32.mrf.mxu2 }
 0x1f8   : > { %v892_v14 = vpop.f32.mrf.mxu1 }
 0x1f9   : > { %v893_v45 = vadd.f32 %v3701_v19, %v892_v14 }
 0x1fb   : > { %v922_v6 = vadd.f32 %v921_v49, %v893_v45  ;;  %v1059_v49 = vsel %vm430_vm4, %v431_v50, %v1058_v47 }
 0x1fe   : > { %v931_v33 = vpop.f32.mrf.mxu2 }
 0x200   : > { %v3696_v23 = vpop.f32.mrf.mxu1 }
 0x206   : > { %v3703_v59 = vpop.f32.mrf.mxu2 }
 0x208   : > { %v897_v26 = vpop.f32.mrf.mxu1 }
 0x209   : > { %v898_v34 = vadd.f32 %v3701_v19, %v897_v26  ;;  %v895_v26 = vadd.f32 %v3701_v19, %v3696_v23 }
 0x20b   : > { %v927_v28 = vadd.f32 %v926_v55, %v898_v34 }
 0x20d   : > { %v956_v38 = vadd.f32 %v955_v44, %v927_v28 }
 0x20e   : > { %v945_v46 = vpop.f32.mrf.mxu2 }
 0x20f   : > { %v3710_v52 = vadd.f32 %v982_v39, %v956_v38  ;;  %v946_v41 = vadd.f32 %v945_v46, %v917_v31  ;;  %v962_v39 = vpop.f32.mrf.mxu3 }
 0x210   : > { %v899_v61 = vpop.f32.mrf.mxu1 }
 0x211   : > { %v1009_v63 = vmax.f32 %v3710_v52, 0.0  ;;  %v3717_v2 = vadd.f32 %v974_v36, %v946_v41  ;;  %v900_v3 = vadd.f32 %v3701_v19, %v899_v61 }
 0x213   : > { %1017 = vst.msk [vmem:[#allocation2 + $0x51] sm:$0xff] %vm224_vm0, %v1009_v63  ;;  %v1005_v27 = vmax.f32 %v3717_v2, 0.0  ;;  %v929_v56 = vadd.f32 %v928_v22, %v900_v3  ;;  %v986_v22 = vpop.permute.xlu0 %985 }
 0x215   : > { %1013 = vst.msk [vmem:[#allocation2 + $0x11] sm:$0xff] %vm224_vm0, %v1005_v27  ;;  %v958_v11 = vadd.f32 %v957_v58, %v929_v56 }
 0x216   : > { %v947_v9 = vpop.f32.mrf.mxu2 }
 0x217   : > { %v3729_v51 = vadd.f32 %v984_v60, %v958_v11  ;;  %v948_v20 = vadd.f32 %v947_v9, %v919_v5 }
 0x218   : > { %v902_v12 = vpop.f32.mrf.mxu1 }
 0x219   : > { %v1010_v30 = vmax.f32 %v3729_v51, 0.0  ;;  %v3733_v13 = vadd.f32 %v976_v29, %v948_v20  ;;  %v903_v16 = vadd.f32 %v3701_v19, %v902_v12 }
 0x21b   : > { %1018 = vst.msk [vmem:[#allocation2 + $0x61] sm:$0xff] %vm224_vm0, %v1010_v30  ;;  %v1006_v17 = vmax.f32 %v3733_v13, 0.0  ;;  %v932_v43 = vadd.f32 %v931_v33, %v903_v16 }
 0x21c   : > { %v3740_v10 = vld [vmem:[#allocation2 + $0x10] sm:$0xff]  ;;  %v1024_v32 = vld [vmem:[#allocation2 + $0x18] sm:$0x3] }
 0x21d   : > { %1014 = vst.msk [vmem:[#allocation2 + $0x21] sm:$0xff] %vm224_vm0, %v1006_v17  ;;  %v961_v25 = vadd.f32 %v960_v24, %v932_v43  ;;  %v1084_v18 = vrot.slane %v3740_v10, 2  ;;  %v1085_v55 = vrot.slane %v1024_v32, 2  ;;  %v1060_v8 = vrot.slane %v3740_v10, 1 }
 0x21e   : > { %v950_v14 = vpop.f32.mrf.mxu2  ;;  %v1061_v33 = vrot.slane %v1024_v32, 1 }
 0x21f   : > { %v3753_v29 = vadd.f32 %v986_v22, %v961_v25  ;;  %v951_v54 = vadd.f32 %v950_v14, %v922_v6  ;;  %v1086_v44 = vsel %vm455_vm3, %v1084_v18, %v1085_v55 }
 0x220   : > { %v904_v35 = vpop.f32.mrf.mxu1  ;;  %v2887_v34 = vpack.i.bf16 %v1086_v44, %v1083_v1  ;;  %v3759_v36 = vsel %vm430_vm4, %v1060_v8, %v1061_v33 }
 0x221   : > { %v1011_v28 = vmax.f32 %v3753_v29, 0.0  ;;  %v3762_v57 = vadd.f32 %v978_v37, %v951_v54  ;;  %v905_v50 = vadd.f32 %v3701_v19, %v904_v35  ;;  %v2882_v38 = vpack.i.bf16 %v3759_v36, %v1059_v49  ;;  %v3823_v54 = vld [vmem:[#allocation2 + $0x50] sm:$0xff] }
 0x222   : > { %2888 = vrot.lane.b32.xlu0 %v2887_v34, %s3193_s23  ;;  %v924_v37 = vadd.f32 %v3694_v48, %v895_v26 }
 0x223   : > { %1019 = vst.msk [vmem:[#allocation2 + $0x71] sm:$0xff] %vm224_vm0, %v1011_v28  ;;  %v1007_v23 = vmax.f32 %v3762_v57, 0.0  ;;  %v934_v31 = vadd.f32 %v3703_v59, %v905_v50  ;;  %2883 = vrot.lane.b32.xlu2 %v2882_v38, %s3191_s16  ;;  %v988_v59 = vpop.permute.xlu1 %987  ;;  %v1096_v50 = vrot.slane %v3823_v54, 2 }
 0x224   : > { %v3774_v46 = vld [vmem:[#allocation2 + $0x20] sm:$0xff]  ;;  %v1026_v19 = vld [vmem:[#allocation2 + $0x28] sm:$0x3] }
 0x225   : > { %1015 = vst.msk [vmem:[#allocation2 + $0x31] sm:$0xff] %vm224_vm0, %v1007_v23  ;;  %v963_v41 = vadd.f32 %v962_v39, %v934_v31  ;;  %v2892_v58 = vpack.i.bf16 %v3774_v46, %v3740_v10  ;;  %v1087_v61 = vrot.slane %v3774_v46, 2  ;;  %v1088_v62 = vrot.slane %v1026_v19, 2 }
 0x226   : > { %v952_v21 = vpop.f32.mrf.mxu2  ;;  %v1063_v45 = vrot.slane %v3774_v46, 1  ;;  %v1064_v12 = vrot.slane %v1026_v19, 1  ;;  %v1072_v31 = vrot.slane %v3823_v54, 1 }
 0x227   : > { %v3782_v3 = vadd.f32 %v988_v59, %v963_v41  ;;  %v953_v56 = vadd.f32 %v952_v21, %v924_v37  ;;  %2893 = vrot.lane.b32.xlu1 %v2892_v58, %s3192_s17  ;;  %v1089_v48 = vsel %vm455_vm3, %v1087_v61, %v1088_v62  ;;  %v3839_v58 = vld [vmem:[#allocation2 + $0x60] sm:$0xff]  ;;  %v1034_v61 = vld [vmem:[#allocation2 + $0x68] sm:$0x3] }
 0x228   : > { %v2897_v11 = vpack.i.bf16 %v1089_v48, %v1086_v44  ;;  %v3808_v32 = vsel %vm430_vm4, %v1063_v45, %v1064_v12  ;;  %v1032_v44 = vld [vmem:[#allocation2 + $0x58] sm:$0x3] }
 0x229   : > { %v1012_v5 = vmax.f32 %v3782_v3, 0.0  ;;  %v3788_v7 = vadd.f32 %v3724_v42, %v953_v56  ;;  %v1097_v38 = vrot.slane %v1032_v44, 2  ;;  %v1073_v39 = vrot.slane %v1032_v44, 1 }
 0x22a   : > { %v1099_v56 = vrot.slane %v3839_v58, 2  ;;  %v3851_v45 = vld [vmem:[#allocation2 + $0x70] sm:$0xff]  ;;  %v1036_v12 = vld [vmem:[#allocation2 + $0x78] sm:$0x3] }
 0x22b   : > { %1020 = vst.msk [vmem:[#allocation2 + $0x81] sm:$0xff] %vm224_vm0, %v1012_v5  ;;  %v1008_v60 = vmax.f32 %v3788_v7, 0.0  ;;  %2898 = vrot.lane.b32.xlu2 %v2897_v11, %s3191_s16  ;;  %v1098_v41 = vsel %vm455_vm3, %v1096_v50, %v1097_v38  ;;  %v3842_v59 = vsel %vm430_vm4, %v1072_v31, %v1073_v39  ;;  %v1040_v31 = vld [vmem:[#allocation2 + $0x98] sm:$0x3] }
 0x22c   : > { %v3795_v9 = vld [vmem:[#allocation2 + $0x30] sm:$0xff]  ;;  %v1028_v20 = vld [vmem:[#allocation2 + $0x38] sm:$0x3] }
 0x22d   : > { %1016 = vst.msk [vmem:[#allocation2 + $0x41] sm:$0xff] %vm224_vm0, %v1008_v60  ;;  %v1090_v42 = vrot.slane %v3795_v9, 2  ;;  %v1091_v15 = vrot.slane %v1028_v20, 2  ;;  %v2902_v16 = vpack.i.bf16 %v3795_v9, %v3774_v46  ;;  %v1066_v24 = vrot.slane %v3795_v9, 1 }
 0x22e   : > { %v1067_v47 = vrot.slane %v1028_v20, 1 }
 0x22f   : > { %v1092_v43 = vsel %vm455_vm3, %v1090_v42, %v1091_v15  ;;  %2903 = vrot.lane.b32.xlu0 %v2902_v16, %s3193_s23  ;;  %v2942_v42 = vpack.i.bf16 %v3839_v58, %v3823_v54  ;;  %v1102_v16 = vrot.slane %v3851_v45, 2 }
 0x230   : > { %v1331_v6 = vpack.c.bf16 %v1092_v43, %v1089_v48  ;;  %v3811_v1 = vsel %vm430_vm4, %v1066_v24, %v1067_v47  ;;  %v2917_v8 = vpack.i.bf16 %v1092_v43, %v1089_v48  ;;  %v1100_v48 = vrot.slane %v1034_v61, 2 }
 0x231   : > { %v2907_v25 = vpack.i.bf16 %v3811_v1, %v3808_v32  ;;  %v1103_v24 = vrot.slane %v1036_v12, 2  ;;  %v1078_v47 = vrot.slane %v3851_v45, 1 }
 0x232   : > { %2517 = vmatmul.msk.bf16.vlgmr.msra.gmra.mxu1 %vm224_vm0, %v1331_v6  ;;  %v1101_v20 = vsel %vm455_vm3, %v1099_v56, %v1100_v48  ;;  %v1075_v6 = vrot.slane %v3839_v58, 1 }
 0x233   : > { %2908 = vrot.lane.b32.xlu1 %v2907_v25, %s3192_s17  ;;  %2913 = vrot.lane.b32.xlu2 %v2907_v25, %s3191_s16  ;;  %v2952_v15 = vpack.i.bf16 %v1101_v20, %v1098_v41  ;;  %v1076_v25 = vrot.slane %v1034_v61, 1 }
 0x234   : > { %v3818_v18 = vld [vmem:[#allocation2 + $0x40] sm:$0xff]  ;;  %v1030_v55 = vld [vmem:[#allocation2 + $0x48] sm:$0x3] }
 0x235   : > { %v1093_v22 = vrot.slane %v3818_v18, 2  ;;  %v1094_v14 = vrot.slane %v1030_v55, 2  ;;  %v2922_v26 = vpack.i.bf16 %v3818_v18, %v3795_v9  ;;  %v1069_v35 = vrot.slane %v3818_v18, 1 }
 0x236   : > { %v1070_v34 = vrot.slane %v1030_v55, 1  ;;  %v2927_v37 = vpack.i.bf16 %v3823_v54, %v3818_v18  ;;  %v2962_v55 = vpack.i.bf16 %v3851_v45, %v3839_v58  ;;  %v3869_v44 = vsel %vm430_vm4, %v1075_v6, %v1076_v25  ;;  %v2672_v6 = vld [vmem:[%s4350_s3 + $0xa0] sm:$0xff]  ;;  %v2682_v25 = vld [vmem:[%s4350_s3 + $0xf0] sm:$0xff] }
 0x237   : > { %2918 = vrot.lane.b32.xlu0 %v2917_v8, %s3193_s23  ;;  %v1095_v49 = vsel %vm455_vm3, %v1093_v22, %v1094_v14  ;;  %v1104_v8 = vsel %vm455_vm3, %v1102_v16, %v1103_v24  ;;  %v1037_v14 = vld [vmem:[#allocation2 + $0x80] sm:$0xff]  ;;  %v2674_v16 = vld [vmem:[%s4350_s3 + $0xb0] sm:$0xff] }
 0x238   : > { %v2932_v33 = vpack.i.bf16 %v1095_v49, %v1092_v43  ;;  %v3835_v19 = vsel %vm430_vm4, %v1069_v35, %v1070_v34  ;;  %v1334_v62 = vpack.c.bf16 %v1098_v41, %v1095_v49  ;;  %v2957_v11 = vpack.i.bf16 %v1098_v41, %v1095_v49  ;;  %v1038_v49 = vld [vmem:[#allocation2 + $0x88] sm:$0x3]  ;;  %v2684_v24 = vld [vmem:[%s4350_s3 + $0x100] sm:$0xff] }
 0x239   : > { %v2937_v21 = vpack.i.bf16 %v3842_v59, %v3835_v19  ;;  %v1079_v43 = vrot.slane %v1036_v12, 1  ;;  %v1118_v35 = vrot.slane %v1037_v14, 2  ;;  %v1119_v34 = vrot.slane %v1038_v49, 2 }
 0x23a   : > { %v2977_v50 = vpack.i.bf16 %v1104_v8, %v1101_v20  ;;  %v2982_v39 = vpack.i.bf16 %v1037_v14, %v3851_v45  ;;  %v1127_v41 = vrot.slane %v1040_v31, 2  ;;  %v1107_v61 = vrot.slane %v1037_v14, 1 }
 0x23b   : > { %2923 = vrot.lane.b32.xlu1 %v2922_v26, %s3192_s17  ;;  %2933 = vrot.lane.b32.xlu2 %v2932_v33, %s3191_s16  ;;  %v3865_v22 = vsel %vm430_vm4, %v1078_v47, %v1079_v43  ;;  %v1337_v33 = vpack.c.bf16 %v1104_v8, %v1101_v20  ;;  %v1120_v38 = vsel %vm455_vm3, %v1118_v35, %v1119_v34  ;;  %v2673_v47 = vld [vmem:[%s4350_s3 + $0xa8] sm:$0xff]  ;;  %v2683_v43 = vld [vmem:[%s4350_s3 + $0xf8] sm:$0xff] }
 0x23c   : > { %v2967_v26 = vpack.i.bf16 %v3865_v22, %v3869_v44  ;;  %v2992_v56 = vpack.i.bf16 %v3449_v40, %v1037_v14  ;;  %v1128_v48 = vsel %vm455_vm3, %v501_v53, %v1127_v41  ;;  %v2676_v53 = vld [vmem:[%s4350_s3 + $0xc0] sm:$0xff]  ;;  %v2675_v40 = vld [vmem:[%s4350_s3 + $0xb8] sm:$0xff]  ;;  %v2670_v14 = vld [vmem:[%s4350_s3 + $0x90] sm:$0xff] }
 0x23d   : > { %v1340_v12 = vpack.c.bf16 %v1128_v48, %v1120_v38 }
 0x23f   : > { %2928 = vrot.lane.b32.xlu0 %v2927_v37, %s3193_s23  ;;  %v2987_v37 = vpack.i.bf16 %v1120_v38, %v1104_v8  ;;  %v2681_v8 = vld [vmem:[%s4350_s3 + $0xe8] sm:$0xff] }
 0x242   : > { %2518 = vmatmul.msk.bf16.gmra.mxu1 %vm224_vm0, %v1334_v62  ;;  %v1108_v62 = vrot.slane %v1038_v49, 1  ;;  %v2680_v49 = vld [vmem:[%s4350_s3 + $0xe0] sm:$0xff] }
 0x243   : > { %2938 = vrot.lane.b32.xlu1 %v2937_v21, %s3192_s17  ;;  %2948 = vrot.lane.b32.xlu2 %v2937_v21, %s3191_s16  ;;  %v1124_v21 = vrot.slane %v1040_v31, 1 }
 0x245   : > { %v1125_v20 = vsel %vm430_vm4, %v498_v4, %v1124_v21  ;;  %v2685_v4 = vld [vmem:[%s4350_s3 + $0x108] sm:$0xff] }
 0x246   : > { %1532 = vmatpush.bf16.msrb.mxu0 %v2685_v4 }
 0x247   : > { %2958 = vrot.lane.b32.xlu0 %v2957_v11, %s3193_s23  ;;  %v3886_v11 = vsel %vm430_vm4, %v1107_v61, %v1108_v62 }
 0x24a   : > { %1533 = vmatpush.bf16.msrb.mxu0 %v2684_v24 }
 0x24b   : > { %2943 = vrot.lane.b32.xlu1 %v2942_v42, %s3192_s17  ;;  %2953 = vrot.lane.b32.xlu2 %v2952_v15, %s3191_s16  ;;  %v2677_v42 = vld [vmem:[%s4350_s3 + $0xc8] sm:$0xff]  ;;  %v2997_v15 = vpack.i.bf16 %v1125_v20, %v3886_v11 }
 0x24c   : > { %1503 = vmatpush.bf16.msrb.mxu3 %v2677_v42 }
 0x24e   : > { %1534 = vmatpush.bf16.msrb.mxu0 %v2683_v43 }
 0x24f   : > { %2963 = vrot.lane.b32.xlu0 %v2962_v55, %s3193_s23  ;;  %v2671_v55 = vld [vmem:[%s4350_s3 + $0x98] sm:$0xff] }
 0x250   : > { %1504 = vmatpush.bf16.msrb.mxu3 %v2676_v53 }
 0x252   : > { %2519 = vmatmul.msk.bf16.gmra.mxu1 %vm224_vm0, %v1337_v33  ;;  %1535 = vmatpush.bf16.msrb.mxu0 %v2682_v25  ;;  %v2679_v33 = vld [vmem:[%s4350_s3 + $0xd8] sm:$0xff] }
 0x253   : > { %2968 = vrot.lane.b32.xlu1 %v2967_v26, %s3192_s17  ;;  %2973 = vrot.lane.b32.xlu2 %v2967_v26, %s3191_s16  ;;  %v2678_v26 = vld [vmem:[%s4350_s3 + $0xd0] sm:$0xff] }
 0x254   : > { %1505 = vmatpush.bf16.msrb.mxu3 %v2675_v40 }
 0x256   : > { %1536 = vmatpush.bf16.msrb.mxu0 %v2681_v8 }
 0x257   : > { %2978 = vrot.lane.b32.xlu0 %v2977_v50, %s3193_s23 }
 0x258   : > { %1506 = vmatpush.bf16.msrb.mxu3 %v2674_v16 }
 0x25a   : > { %1537 = vmatpush.bf16.msrb.mxu0 %v2680_v49 }
 0x25b   : > { %2983 = vrot.lane.b32.xlu1 %v2982_v39, %s3192_s17  ;;  %2988 = vrot.lane.b32.xlu2 %v2987_v37, %s3191_s16 }
 0x25c   : > { %1507 = vmatpush.bf16.msrb.mxu3 %v2673_v47 }
 0x25e   : > { %1538 = vmatpush.bf16.msrb.mxu0 %v2679_v33 }
 0x25f   : > { %2993 = vrot.lane.b32.xlu0 %v2992_v56, %s3193_s23 }
 0x260   : > { %1508 = vmatpush.bf16.msrb.mxu3 %v2672_v6 }
 0x262   : > { %2520 = vmatmul.msk.bf16.gmra.mxu1 %vm224_vm0, %v1340_v12  ;;  %1539 = vmatpush.bf16.msrb.mxu0 %v2678_v26 }
 0x263   : > { %2998 = vrot.lane.b32.xlu1 %v2997_v15, %s3192_s17 }
 0x264   : > { %1509 = vmatpush.bf16.msrb.mxu3 %v2671_v55 }
 0x268   : > { %1510 = vmatpush.bf16.msrb.mxu3 %v2670_v14 }
 0x27d   : > { %v2884_v35 = vpop.permute.xlu2 %2883 }
 0x27e   : > { %v2886_v38 = vunpack.i.h.bf16 %v2884_v35  ;;  %v2885_v31 = vunpack.i.l.bf16 %v2884_v35 }
 0x280   : > { %v1282_v61 = vsel %vm224_vm0, %v3740_v10, %v2886_v38  ;;  %v1281_v62 = vsel %vm224_vm0, %v3477_v0, %v2885_v31 }
 0x285   : > { %v2899_v34 = vpop.permute.xlu2 %2898 }
 0x286   : > { %v2901_v4 = vunpack.i.h.bf16 %v2899_v34  ;;  %v2900_v16 = vunpack.i.l.bf16 %v2899_v34 }
 0x288   : > { %v1306_v0 = vsel %vm224_vm0, %v3808_v32, %v2901_v4  ;;  %v1305_v43 = vsel %vm224_vm0, %v3759_v36, %v2900_v16 }
 0x28d   : > { %v2914_v15 = vpop.permute.xlu2 %2913 }
 0x28e   : > { %v2916_v34 = vunpack.i.h.bf16 %v2914_v15 }
 0x290   : > { %v1284_v36 = vsel %vm224_vm0, %v3795_v9, %v2916_v34 }
 0x294   : > { %v2889_v50 = vpop.permute.xlu0 %2888 }
 0x295   : > { %v2891_v39 = vunpack.i.h.bf16 %v2889_v50  ;;  %v2890_v37 = vunpack.i.l.bf16 %v2889_v50  ;;  %v2934_v55 = vpop.permute.xlu2 %2933  ;;  %v2915_v50 = vunpack.i.l.bf16 %v2914_v15 }
 0x296   : > { %v2935_v15 = vunpack.i.l.bf16 %v2934_v55 }
 0x297   : > { %v1289_v48 = vsel %vm664_vm5, %v1281_v62, %v2890_v37  ;;  %v1290_v20 = vsel %vm664_vm5, %v1282_v61, %v2891_v39  ;;  %v1283_v39 = vsel %vm224_vm0, %v3774_v46, %v2915_v50 }
 0x298   : > { %v1307_v4 = vsel %vm224_vm0, %v3811_v1, %v2935_v15 }
 0x299   : > { %v2894_v41 = vpop.permute.xlu1 %2893 }
 0x29a   : > { %v2896_v21 = vunpack.i.h.bf16 %v2894_v41  ;;  %v2895_v56 = vunpack.i.l.bf16 %v2894_v41 }
 0x29c   : > { %v1297_v12 = vsel %vm673_vm6, %v1289_v48, %v2895_v56  ;;  %v1298_v42 = vsel %vm673_vm6, %v1290_v20, %v2896_v21 }
 0x29d   : > { %v1329_v53 = vpack.c.bf16 %v1298_v42, %v1297_v12  ;;  %v2949_v48 = vpop.permute.xlu2 %2948  ;;  %v2936_v42 = vunpack.i.h.bf16 %v2934_v55 }
 0x29e   : > { %v2951_v55 = vunpack.i.h.bf16 %v2949_v48 }
 0x29f   : > { %1511 = vmatmul.bf16.vlgmr.msrb.gmra.mxu3 %v1329_v53  ;;  %v1308_v46 = vsel %vm224_vm0, %v3835_v19, %v2936_v42 }
 0x2a0   : > { %v1286_v1 = vsel %vm224_vm0, %v3823_v54, %v2951_v55 }
 0x2a1   : > { %v2904_v40 = vpop.permute.xlu0 %2903 }
 0x2a2   : > { %v2906_v10 = vunpack.i.h.bf16 %v2904_v40  ;;  %v2905_v24 = vunpack.i.l.bf16 %v2904_v40 }
 0x2a4   : > { %v1313_v8 = vsel %vm664_vm5, %v1305_v43, %v2905_v24  ;;  %v1314_v14 = vsel %vm664_vm5, %v1306_v0, %v2906_v10 }
 0x2a5   : > { %v2909_v47 = vpop.permute.xlu1 %2908 }
 0x2a6   : > { %v2911_v6 = vunpack.i.h.bf16 %v2909_v47  ;;  %v2910_v25 = vunpack.i.l.bf16 %v2909_v47 }
 0x2a8   : > { %v1321_v49 = vsel %vm673_vm6, %v1313_v8, %v2910_v25  ;;  %v1322_v33 = vsel %vm673_vm6, %v1314_v14, %v2911_v6  ;;  %v2950_v8 = vunpack.i.l.bf16 %v2949_v48  ;;  %v2954_v14 = vpop.permute.xlu2 %2953 }
 0x2a9   : > { %v2919_v26 = vpop.permute.xlu0 %2918  ;;  %v1330_v35 = vpack.c.bf16 %v1322_v33, %v1321_v49 }
 0x2aa   : > { %v2921_v38 = vunpack.i.h.bf16 %v2919_v26  ;;  %v2920_v32 = vunpack.i.l.bf16 %v2919_v26  ;;  %v1285_v26 = vsel %vm224_vm0, %v3818_v18, %v2950_v8 }
 0x2ab   : > { %1540 = vmatmul.bf16.vlgmr.msrb.gmra.mxu0 %v1330_v35 }
 0x2ac   : > { %v1291_v61 = vsel %vm664_vm5, %v1283_v39, %v2920_v32  ;;  %v1292_v62 = vsel %vm664_vm5, %v1284_v36, %v2921_v38 }
 0x2ad   : > { %v2924_v31 = vpop.permute.xlu1 %2923 }
 0x2ae   : > { %v2926_v37 = vunpack.i.h.bf16 %v2924_v31  ;;  %v2925_v41 = vunpack.i.l.bf16 %v2924_v31 }
 0x2b0   : > { %v1299_v21 = vsel %vm673_vm6, %v1291_v61, %v2925_v41  ;;  %v1300_v56 = vsel %vm673_vm6, %v1292_v62, %v2926_v37  ;;  %v2956_v37 = vunpack.i.h.bf16 %v2954_v14  ;;  %v2955_v41 = vunpack.i.l.bf16 %v2954_v14  ;;  %v2974_v54 = vpop.permute.xlu2 %2973 }
 0x2b1   : > { %v2929_v20 = vpop.permute.xlu0 %2928  ;;  %v1332_v12 = vpack.c.bf16 %v1300_v56, %v1299_v21 }
 0x2b2   : > { %v2931_v53 = vunpack.i.h.bf16 %v2929_v20  ;;  %v2930_v9 = vunpack.i.l.bf16 %v2929_v20  ;;  %v1310_v18 = vsel %vm224_vm0, %v3869_v44, %v2956_v37  ;;  %v1309_v56 = vsel %vm224_vm0, %v3842_v59, %v2955_v41  ;;  %v1570_v37 = vpop.f32.mrf.mxu1 }
 0x2b3   : > { %1516 = vmatmul.bf16.gmra.mxu3 %v1332_v12 }
 0x2b4   : > { %v1315_v24 = vsel %vm664_vm5, %v1307_v4, %v2930_v9  ;;  %v1316_v47 = vsel %vm664_vm5, %v1308_v46, %v2931_v53  ;;  %v2976_v46 = vunpack.i.h.bf16 %v2974_v54  ;;  %v2975_v4 = vunpack.i.l.bf16 %v2974_v54 }
 0x2b5   : > { %v2939_v40 = vpop.permute.xlu1 %2938 }
 0x2b6   : > { %v2941_v16 = vunpack.i.h.bf16 %v2939_v40  ;;  %v2940_v10 = vunpack.i.l.bf16 %v2939_v40  ;;  %v1288_v59 = vsel %vm224_vm0, %v3851_v45, %v2976_v46 }
 0x2b8   : > { %v1323_v0 = vsel %vm673_vm6, %v1315_v24, %v2940_v10  ;;  %v1324_v43 = vsel %vm673_vm6, %v1316_v47, %v2941_v16  ;;  %v1287_v24 = vsel %vm224_vm0, %v3839_v58, %v2975_v4 }
 0x2b9   : > { %v2959_v6 = vpop.permute.xlu0 %2958  ;;  %v1333_v25 = vpack.c.bf16 %v1324_v43, %v1323_v0  ;;  %v2989_v43 = vpop.permute.xlu2 %2988 }
 0x2ba   : > { %v2961_v49 = vunpack.i.h.bf16 %v2959_v6  ;;  %v2960_v19 = vunpack.i.l.bf16 %v2959_v6 }
 0x2bb   : > { %1545 = vmatmul.bf16.gmra.mxu0 %v1333_v25 }
 0x2bc   : > { %v1293_v50 = vsel %vm664_vm5, %v1285_v26, %v2960_v19  ;;  %v1294_v38 = vsel %vm664_vm5, %v1286_v1, %v2961_v49  ;;  %v2991_v19 = vunpack.i.h.bf16 %v2989_v43 }
 0x2bd   : > { %v2944_v33 = vpop.permute.xlu1 %2943 }
 0x2be   : > { %v2946_v35 = vunpack.i.h.bf16 %v2944_v33  ;;  %v2945_v34 = vunpack.i.l.bf16 %v2944_v33  ;;  %v2990_v33 = vunpack.i.l.bf16 %v2989_v43  ;;  %v1312_v58 = vsel %vm224_vm0, %v3886_v11, %v2991_v19  ;;  %v4010_v11 = vld [vmem:[%s4351_s4 + $0x1] ss:$0 sm:$0xff] }
 0x2c0   : > { %v1301_v32 = vsel %vm673_vm6, %v1293_v50, %v2945_v34  ;;  %v1302_v31 = vsel %vm673_vm6, %v1294_v38, %v2946_v35  ;;  %v1311_v35 = vsel %vm224_vm0, %v3865_v22, %v2990_v33  ;;  %v2705_v22 = vld [vmem:[%s4350_s3 + $0x1a8] sm:$0xff] }
 0x2c1   : > { %v2964_v36 = vpop.permute.xlu0 %2963  ;;  %v1335_v39 = vpack.c.bf16 %v1302_v31, %v1301_v32  ;;  %2152 = vmatpush.bf16.msra.mxu0 %v2705_v22 }
 0x2c2   : > { %v2966_v61 = vunpack.i.h.bf16 %v2964_v36  ;;  %v2965_v62 = vunpack.i.l.bf16 %v2964_v36 }
 0x2c3   : > { %1521 = vmatmul.bf16.gmra.mxu3 %v1335_v39 }
 0x2c4   : > { %v1317_v12 = vsel %vm664_vm5, %v1309_v56, %v2965_v62  ;;  %v1318_v42 = vsel %vm664_vm5, %v1310_v18, %v2966_v61  ;;  %v1572_v61 = vpop.f32.mrf.mxu1  ;;  %v2704_v18 = vld [vmem:[%s4350_s3 + $0x1a0] sm:$0xff] }
 0x2c5   : > { %v2969_v21 = vpop.permute.xlu1 %2968  ;;  %2153 = vmatpush.bf16.msra.mxu0 %v2704_v18 }
 0x2c6   : > { %v2971_v48 = vunpack.i.h.bf16 %v2969_v21  ;;  %v2970_v20 = vunpack.i.l.bf16 %v2969_v21 }
 0x2c8   : > { %v1325_v15 = vsel %vm673_vm6, %v1317_v12, %v2970_v20  ;;  %v1326_v53 = vsel %vm673_vm6, %v1318_v42, %v2971_v48  ;;  %v4021_v42 = vld [vmem:[#allocation2] sm:$0xff] }
 0x2c9   : > { %v2979_v9 = vpop.permute.xlu0 %2978  ;;  %v1336_v40 = vpack.c.bf16 %v1326_v53, %v1325_v15  ;;  %v1607_v15 = vld [vmem:[#allocation2 + $0x8] sm:$0x3]  ;;  %v1666_v46 = vrot.slane %v4021_v42, 2 }
 0x2ca   : > { %v2981_v16 = vunpack.i.h.bf16 %v2979_v9  ;;  %v2980_v10 = vunpack.i.l.bf16 %v2979_v9  ;;  %v1667_v4 = vrot.slane %v1607_v15, 2 }
 0x2cb   : > { %1550 = vmatmul.bf16.gmra.mxu0 %v1336_v40 }
 0x2cc   : > { %v1295_v6 = vsel %vm664_vm5, %v1287_v24, %v2980_v10  ;;  %v1296_v25 = vsel %vm664_vm5, %v1288_v59, %v2981_v16  ;;  %v1575_v53 = vpop.f32.mrf.mxu1  ;;  %v1642_v10 = vrot.slane %v4021_v42, 1  ;;  %v1668_v43 = vsel %vm455_vm3, %v1666_v46, %v1667_v4 }
 0x2cd   : > { %v2984_v44 = vpop.permute.xlu1 %2983 }
 0x2ce   : > { %v2986_v47 = vunpack.i.h.bf16 %v2984_v44  ;;  %v2985_v0 = vunpack.i.l.bf16 %v2984_v44  ;;  %v1643_v44 = vrot.slane %v1607_v15, 1 }
 0x2d0   : > { %v1303_v55 = vsel %vm673_vm6, %v1295_v6, %v2985_v0  ;;  %v1304_v8 = vsel %vm673_vm6, %v1296_v25, %v2986_v47 }
 0x2d1   : > { %v2994_v14 = vpop.permute.xlu0 %2993  ;;  %v1338_v49 = vpack.c.bf16 %v1304_v8, %v1303_v55 }
 0x2d2   : > { %v2996_v1 = vunpack.i.h.bf16 %v2994_v14  ;;  %v2995_v45 = vunpack.i.l.bf16 %v2994_v14 }
 0x2d3   : > { %1526 = vmatmul.bf16.gmra.mxu3 %v1338_v49  ;;  %v1644_v49 = vsel %vm430_vm4, %v1642_v10, %v1643_v44 }
 0x2d4   : > { %v1319_v38 = vsel %vm664_vm5, %v1311_v35, %v2995_v45  ;;  %v1320_v32 = vsel %vm664_vm5, %v1312_v58, %v2996_v1  ;;  %v1577_v45 = vpop.f32.mrf.mxu1 }
 0x2d5   : > { %v2999_v26 = vpop.permute.xlu1 %2998 }
 0x2d6   : > { %v3001_v34 = vunpack.i.h.bf16 %v2999_v26  ;;  %v3000_v50 = vunpack.i.l.bf16 %v2999_v26 }
 0x2d8   : > { %v1327_v31 = vsel %vm673_vm6, %v1319_v38, %v3000_v50  ;;  %v1328_v36 = vsel %vm673_vm6, %v1320_v32, %v3001_v34 }
 0x2d9   : > { %v1339_v39 = vpack.c.bf16 %v1328_v36, %v1327_v31 }
 0x2db   : > { %1555 = vmatmul.bf16.gmra.mxu0 %v1339_v39 }
 0x2dc   : > { %v1580_v18 = vpop.f32.mrf.mxu1 }
 0x322   : > { %v1512_v41 = vpop.f32.mrf.mxu3 }
 0x323   : > { %v1513_v62 = vadd.f32 %v4010_v11, %v1512_v41 }
 0x328   : > { %v1541_v54 = vpop.f32.mrf.mxu0 }
 0x329   : > { %v1542_v21 = vadd.f32 %v1541_v54, %v1513_v62 }
 0x32a   : > { %v1514_v48 = vpop.f32.mrf.mxu3 }
 0x32b   : > { %v1571_v56 = vadd.f32 %v1570_v37, %v1542_v21  ;;  %v1515_v12 = vadd.f32 %v4010_v11, %v1514_v48 }
 0x32d   : > { %v1590_v20 = vmax.f32 %v1571_v56, 0.0 }
 0x32f   : > { %1598 = vst.msk [vmem:[#allocation2 + $0x11] sm:$0xff] %vm224_vm0, %v1590_v20 }
 0x330   : > { %v1543_v9 = vpop.f32.mrf.mxu0 }
 0x331   : > { %v1544_v40 = vadd.f32 %v1543_v9, %v1515_v12 }
 0x333   : > { %v1573_v16 = vadd.f32 %v1572_v61, %v1544_v40 }
 0x335   : > { %v1591_v59 = vmax.f32 %v1573_v16, 0.0 }
 0x336   : > { %v1517_v24 = vpop.f32.mrf.mxu3  ;;  %v4025_v47 = vld [vmem:[#allocation2 + $0x10] sm:$0xff]  ;;  %v1609_v0 = vld [vmem:[#allocation2 + $0x18] sm:$0x3] }
 0x337   : > { %1599 = vst.msk [vmem:[#allocation2 + $0x21] sm:$0xff] %vm224_vm0, %v1591_v59  ;;  %v1518_v6 = vadd.f32 %v4010_v11, %v1517_v24  ;;  %v1669_v25 = vrot.slane %v4025_v47, 2  ;;  %v1670_v55 = vrot.slane %v1609_v0, 2  ;;  %v1645_v8 = vrot.slane %v4025_v47, 1 }
 0x338   : > { %v1546_v14 = vpop.f32.mrf.mxu0  ;;  %v1646_v19 = vrot.slane %v1609_v0, 1 }
 0x339   : > { %v1547_v33 = vadd.f32 %v1546_v14, %v1518_v6  ;;  %v1671_v1 = vsel %vm455_vm3, %v1669_v25, %v1670_v55  ;;  %v1582_v14 = vpop.f32.mrf.mxu1 }
 0x33a   : > { %v3007_v26 = vpack.i.bf16 %v1671_v1, %v1668_v43  ;;  %v4035_v58 = vsel %vm430_vm4, %v1645_v8, %v1646_v19 }
 0x33b   : > { %v1576_v35 = vadd.f32 %v1575_v53, %v1547_v33  ;;  %v3002_v34 = vpack.i.bf16 %v4035_v58, %v1644_v49 }
 0x33c   : > { %3008 = vrot.lane.b32.xlu0 %v3007_v26, %s3193_s23 }
 0x33d   : > { %v1592_v50 = vmax.f32 %v1576_v35, 0.0  ;;  %3003 = vrot.lane.b32.xlu2 %v3002_v34, %s3191_s16 }
 0x33e   : > { %v1519_v38 = vpop.f32.mrf.mxu3  ;;  %v4040_v32 = vld [vmem:[#allocation2 + $0x20] sm:$0xff]  ;;  %v1611_v31 = vld [vmem:[#allocation2 + $0x28] sm:$0x3] }
 0x33f   : > { %1600 = vst.msk [vmem:[#allocation2 + $0x31] sm:$0xff] %vm224_vm0, %v1592_v50  ;;  %v1520_v36 = vadd.f32 %v4010_v11, %v1519_v38  ;;  %v3012_v39 = vpack.i.bf16 %v4040_v32, %v4025_v47  ;;  %v1672_v37 = vrot.slane %v4040_v32, 2  ;;  %v1673_v41 = vrot.slane %v1611_v31, 2 }
 0x340   : > { %v1548_v22 = vpop.f32.mrf.mxu0  ;;  %v1648_v15 = vrot.slane %v4040_v32, 1  ;;  %v1649_v53 = vrot.slane %v1611_v31, 1 }
 0x341   : > { %v1549_v61 = vadd.f32 %v1548_v22, %v1520_v36  ;;  %3013 = vrot.lane.b32.xlu1 %v3012_v39, %s3192_s17  ;;  %v1674_v62 = vsel %vm455_vm3, %v1672_v37, %v1673_v41 }
 0x342   : > { %v3017_v54 = vpack.i.bf16 %v1674_v62, %v1671_v1  ;;  %v4062_v43 = vsel %vm430_vm4, %v1648_v15, %v1649_v53 }
 0x343   : > { %v1578_v21 = vadd.f32 %v1577_v45, %v1549_v61 }
 0x345   : > { %v1593_v56 = vmax.f32 %v1578_v21, 0.0  ;;  %3018 = vrot.lane.b32.xlu2 %v3017_v54, %s3191_s16 }
 0x346   : > { %v4050_v48 = vld [vmem:[#allocation2 + $0x30] sm:$0xff]  ;;  %v1613_v20 = vld [vmem:[#allocation2 + $0x38] sm:$0x3]  ;;  %v1522_v12 = vpop.f32.mrf.mxu3 }
 0x347   : > { %1601 = vst.msk [vmem:[#allocation2 + $0x41] sm:$0xff] %vm224_vm0, %v1593_v56  ;;  %v1675_v9 = vrot.slane %v4050_v48, 2  ;;  %v1676_v40 = vrot.slane %v1613_v20, 2  ;;  %v1523_v46 = vadd.f32 %v4010_v11, %v1522_v12  ;;  %v3022_v4 = vpack.i.bf16 %v4050_v48, %v4040_v32  ;;  %v1585_v12 = vpop.f32.mrf.mxu1 }
 0x348   : > { %v1551_v16 = vpop.f32.mrf.mxu0  ;;  %v1651_v10 = vrot.slane %v4050_v48, 1  ;;  %v1652_v44 = vrot.slane %v1613_v20, 1 }
 0x349   : > { %v1677_v59 = vsel %vm455_vm3, %v1675_v9, %v1676_v40  ;;  %v1552_v24 = vadd.f32 %v1551_v16, %v1523_v46  ;;  %3023 = vrot.lane.b32.xlu0 %v3022_v4, %s3193_s23 }
 0x34a   : > { %v1916_v0 = vpack.c.bf16 %v1677_v59, %v1674_v62  ;;  %v4065_v6 = vsel %vm430_vm4, %v1651_v10, %v1652_v44  ;;  %v3037_v45 = vpack.i.bf16 %v1677_v59, %v1674_v62 }
 0x34b   : > { %v1581_v25 = vadd.f32 %v1580_v18, %v1552_v24  ;;  %v3027_v55 = vpack.i.bf16 %v4065_v6, %v4062_v43 }
 0x34c   : > { %2630 = vmatmul.msk.bf16.vlgmr.msra.gmra.mxu0 %vm224_vm0, %v1916_v0  ;;  %v2703_v0 = vld [vmem:[%s4350_s3 + $0x198] sm:$0xff] }
 0x34d   : > { %v1594_v8 = vmax.f32 %v1581_v25, 0.0  ;;  %3028 = vrot.lane.b32.xlu1 %v3027_v55, %s3192_s17  ;;  %3033 = vrot.lane.b32.xlu2 %v3027_v55, %s3191_s16 }
 0x34e   : > { %v1524_v49 = vpop.f32.mrf.mxu3  ;;  %v4072_v19 = vld [vmem:[#allocation2 + $0x40] sm:$0xff]  ;;  %v1615_v33 = vld [vmem:[#allocation2 + $0x48] sm:$0x3]  ;;  %2117 = vmatpush.bf16.msra.mxu3 %v2703_v0  ;;  %v1624_v0 = vld [vmem:[#allocation2 + $0x90] sm:$0xff] }
 0x34f   : > { %1602 = vst.msk [vmem:[#allocation2 + $0x51] sm:$0xff] %vm224_vm0, %v1594_v8  ;;  %v1525_v1 = vadd.f32 %v4010_v11, %v1524_v49  ;;  %v1678_v26 = vrot.slane %v4072_v19, 2  ;;  %v1679_v35 = vrot.slane %v1615_v33, 2  ;;  %v3042_v39 = vpack.i.bf16 %v4072_v19, %v4050_v48 }
 0x350   : > { %v1553_v34 = vpop.f32.mrf.mxu0  ;;  %v1654_v62 = vrot.slane %v4072_v19, 1  ;;  %v1655_v54 = vrot.slane %v1615_v33, 1 }
 0x351   : > { %v1554_v50 = vadd.f32 %v1553_v34, %v1525_v1  ;;  %3038 = vrot.lane.b32.xlu0 %v3037_v45, %s3193_s23  ;;  %v1680_v38 = vsel %vm455_vm3, %v1678_v26, %v1679_v35  ;;  %v2702_v45 = vld [vmem:[%s4350_s3 + $0x190] sm:$0xff] }
 0x352   : > { %v3047_v31 = vpack.i.bf16 %v1680_v38, %v1677_v59  ;;  %v4095_v16 = vsel %vm430_vm4, %v1654_v62, %v1655_v54  ;;  %2118 = vmatpush.bf16.msra.mxu3 %v2702_v45  ;;  %v1708_v45 = vrot.slane %v1624_v0, 1 }
 0x353   : > { %v1583_v36 = vadd.f32 %v1582_v14, %v1554_v50  ;;  %v1587_v50 = vpop.f32.mrf.mxu1 }
 0x355   : > { %v1595_v37 = vmax.f32 %v1583_v36, 0.0  ;;  %3043 = vrot.lane.b32.xlu1 %v3042_v39, %s3192_s17  ;;  %3048 = vrot.lane.b32.xlu2 %v3047_v31, %s3191_s16 }
 0x356   : > { %v1527_v41 = vpop.f32.mrf.mxu3  ;;  %v4083_v22 = vld [vmem:[#allocation2 + $0x50] sm:$0xff]  ;;  %v1617_v61 = vld [vmem:[#allocation2 + $0x58] sm:$0x3] }
 0x357   : > { %1603 = vst.msk [vmem:[#allocation2 + $0x61] sm:$0xff] %vm224_vm0, %v1595_v37  ;;  %v1528_v21 = vadd.f32 %v4010_v11, %v1527_v41  ;;  %v3052_v18 = vpack.i.bf16 %v4083_v22, %v4072_v19  ;;  %v1681_v56 = vrot.slane %v4083_v22, 2  ;;  %v1682_v20 = vrot.slane %v1617_v61, 2 }
 0x358   : > { %v1556_v15 = vpop.f32.mrf.mxu0  ;;  %v1657_v53 = vrot.slane %v4083_v22, 1  ;;  %v1658_v9 = vrot.slane %v1617_v61, 1 }
 0x359   : > { %v1557_v40 = vadd.f32 %v1556_v15, %v1528_v21  ;;  %3053 = vrot.lane.b32.xlu0 %v3052_v18, %s3193_s23  ;;  %v1683_v46 = vsel %vm455_vm3, %v1681_v56, %v1682_v20 }
 0x35a   : > { %v1919_v4 = vpack.c.bf16 %v1683_v46, %v1680_v38  ;;  %v4098_v10 = vsel %vm430_vm4, %v1657_v53, %v1658_v9  ;;  %v3067_v49 = vpack.i.bf16 %v1683_v46, %v1680_v38  ;;  %v2701_v38 = vld [vmem:[%s4350_s3 + $0x188] sm:$0xff] }
 0x35b   : > { %v1586_v44 = vadd.f32 %v1585_v12, %v1557_v40  ;;  %v3057_v59 = vpack.i.bf16 %v4098_v10, %v4095_v16  ;;  %2119 = vmatpush.bf16.msra.mxu3 %v2701_v38 }
 0x35c   : > { %2631 = vmatmul.msk.bf16.gmra.mxu0 %vm224_vm0, %v1919_v4 }
 0x35d   : > { %v1596_v24 = vmax.f32 %v1586_v44, 0.0  ;;  %3058 = vrot.lane.b32.xlu1 %v3057_v59, %s3192_s17  ;;  %3063 = vrot.lane.b32.xlu2 %v3057_v59, %s3191_s16 }
 0x35e   : > { %v1529_v25 = vpop.f32.mrf.mxu3  ;;  %v4108_v55 = vld [vmem:[#allocation2 + $0x60] sm:$0xff]  ;;  %v1619_v8 = vld [vmem:[#allocation2 + $0x68] sm:$0x3] }
 0x35f   : > { %1604 = vst.msk [vmem:[#allocation2 + $0x71] sm:$0xff] %vm224_vm0, %v1596_v24  ;;  %v1530_v14 = vadd.f32 %v4010_v11, %v1529_v25  ;;  %v1684_v33 = vrot.slane %v4108_v55, 2  ;;  %v1685_v1 = vrot.slane %v1619_v8, 2  ;;  %v3072_v11 = vpack.i.bf16 %v4108_v55, %v4083_v22  ;;  %v1625_v25 = vld [vmem:[#allocation2 + $0x98] sm:$0x3] }
 0x360   : > { %v1558_v26 = vpop.f32.mrf.mxu0  ;;  %v1660_v61 = vrot.slane %v4108_v55, 1  ;;  %v1661_v62 = vrot.slane %v1619_v8, 1 }
 0x361   : > { %v1559_v35 = vadd.f32 %v1558_v26, %v1530_v14  ;;  %3068 = vrot.lane.b32.xlu0 %v3067_v49, %s3193_s23  ;;  %v1686_v34 = vsel %vm455_vm3, %v1684_v33, %v1685_v1  ;;  %v1711_v33 = vrot.slane %v1624_v0, 2  ;;  %v1712_v1 = vrot.slane %v1625_v25, 2 }
 0x362   : > { %v3077_v31 = vpack.i.bf16 %v1686_v34, %v1683_v46  ;;  %v4136_v53 = vsel %vm430_vm4, %v1660_v61, %v1661_v62  ;;  %v2694_v62 = vld [vmem:[%s4350_s3 + $0x150] sm:$0xff] }
 0x363   : > { %v1588_v36 = vadd.f32 %v1587_v50, %v1559_v35  ;;  %v1709_v50 = vrot.slane %v1625_v25, 1 }
 0x365   : > { %v1597_v39 = vmax.f32 %v1588_v36, 0.0  ;;  %3073 = vrot.lane.b32.xlu1 %v3072_v11, %s3192_s17  ;;  %3078 = vrot.lane.b32.xlu2 %v3077_v31, %s3191_s16  ;;  %v1713_v31 = vsel %vm455_vm3, %v1711_v33, %v1712_v1  ;;  %v1710_v11 = vsel %vm430_vm4, %v1708_v45, %v1709_v50 }
 0x366   : > { %v4125_v37 = vld [vmem:[#allocation2 + $0x70] sm:$0xff]  ;;  %v1621_v41 = vld [vmem:[#allocation2 + $0x78] sm:$0x3] }
 0x367   : > { %1605 = vst.msk [vmem:[#allocation2 + $0x81] sm:$0xff] %vm224_vm0, %v1597_v39  ;;  %v3082_v54 = vpack.i.bf16 %v4125_v37, %v4108_v55  ;;  %v1687_v21 = vrot.slane %v4125_v37, 2  ;;  %v1688_v18 = vrot.slane %v1621_v41, 2  ;;  %v1663_v56 = vrot.slane %v4125_v37, 1  ;;  %v2695_v39 = vld [vmem:[%s4350_s3 + $0x158] sm:$0xff] }
 0x368   : > { %v1664_v20 = vrot.slane %v1621_v41, 1  ;;  %v2700_v41 = vld [vmem:[%s4350_s3 + $0x180] sm:$0xff]  ;;  %2088 = vmatpush.bf16.msra.mxu2 %v2695_v39 }
 0x369   : > { %3083 = vrot.lane.b32.xlu0 %v3082_v54, %s3193_s23  ;;  %v1689_v12 = vsel %vm455_vm3, %v1687_v21, %v1688_v18  ;;  %2120 = vmatpush.bf16.msra.mxu3 %v2700_v41  ;;  %v2693_v54 = vld [vmem:[%s4350_s3 + $0x148] sm:$0xff]  ;;  %v2699_v21 = vld [vmem:[%s4350_s3 + $0x178] sm:$0xff]  ;;  %v2692_v18 = vld [vmem:[%s4350_s3 + $0x140] sm:$0xff] }
 0x36a   : > { %v1922_v15 = vpack.c.bf16 %v1689_v12, %v1686_v34  ;;  %v4139_v9 = vsel %vm430_vm4, %v1663_v56, %v1664_v20  ;;  %v3097_v44 = vpack.i.bf16 %v1689_v12, %v1686_v34  ;;  %v2691_v56 = vld [vmem:[%s4350_s3 + $0x138] sm:$0xff]  ;;  %v2698_v20 = vld [vmem:[%s4350_s3 + $0x170] sm:$0xff] }
 0x36b   : > { %v3087_v40 = vpack.i.bf16 %v4139_v9, %v4136_v53 }
 0x36c   : > { %2632 = vmatmul.msk.bf16.gmra.mxu0 %vm224_vm0, %v1922_v15  ;;  %2089 = vmatpush.bf16.msra.mxu2 %v2694_v62  ;;  %v2689_v15 = vld [vmem:[%s4350_s3 + $0x128] sm:$0xff] }
 0x36d   : > { %3088 = vrot.lane.b32.xlu1 %v3087_v40, %s3192_s17  ;;  %3093 = vrot.lane.b32.xlu2 %v3087_v40, %s3191_s16  ;;  %v2688_v40 = vld [vmem:[%s4350_s3 + $0x120] sm:$0xff] }
 0x36e   : > { %v1622_v46 = vld [vmem:[#allocation2 + $0x80] sm:$0xff]  ;;  %v1623_v4 = vld [vmem:[#allocation2 + $0x88] sm:$0x3]  ;;  %2121 = vmatpush.bf16.msra.mxu3 %v2699_v21 }
 0x36f   : > { %v1703_v59 = vrot.slane %v1622_v46, 2  ;;  %v1704_v24 = vrot.slane %v1623_v4, 2  ;;  %v3102_v49 = vpack.i.bf16 %v1622_v46, %v4125_v37  ;;  %v1692_v26 = vrot.slane %v1622_v46, 1 }
 0x370   : > { %v1693_v35 = vrot.slane %v1623_v4, 1  ;;  %v3112_v34 = vpack.i.bf16 %v1624_v0, %v1622_v46  ;;  %2090 = vmatpush.bf16.msra.mxu2 %v2693_v54  ;;  %v2697_v46 = vld [vmem:[%s4350_s3 + $0x168] sm:$0xff]  ;;  %v2696_v4 = vld [vmem:[%s4350_s3 + $0x160] sm:$0xff] }
 0x371   : > { %3098 = vrot.lane.b32.xlu0 %v3097_v44, %s3193_s23  ;;  %v1705_v8 = vsel %vm455_vm3, %v1703_v59, %v1704_v24 }
 0x372   : > { %v3107_v14 = vpack.i.bf16 %v1705_v8, %v1689_v12  ;;  %v4153_v36 = vsel %vm430_vm4, %v1692_v26, %v1693_v35  ;;  %v1925_v38 = vpack.c.bf16 %v1713_v31, %v1705_v8  ;;  %2122 = vmatpush.bf16.msra.mxu3 %v2698_v20  ;;  %v2690_v12 = vld [vmem:[%s4350_s3 + $0x130] sm:$0xff] }
 0x373   : > { %v3117_v61 = vpack.i.bf16 %v1710_v11, %v4153_v36 }
 0x374   : > { %2091 = vmatpush.bf16.msra.mxu2 %v2692_v18 }
 0x375   : > { %3103 = vrot.lane.b32.xlu1 %v3102_v49, %s3192_s17  ;;  %3108 = vrot.lane.b32.xlu2 %v3107_v14, %s3191_s16  ;;  %s2214_s16 = sshll.u32 %s2211_s9, 4  ;;  %s2215_s16 = int_to_ptr.hbm [resolvable:$true] %s2214_s16 }
 0x376   : > { %2123 = vmatpush.bf16.msra.mxu3 %v2697_v46  ;;  %s3140_s11 = sshra.s32 %s2215_s16, 4  ;;  %s3141_s11 = int_to_ptr.hbm [resolvable:$true] %s3140_s11 }
 0x377   : > { %p3147_p0 = scmp.lt.s32.totalorder %s3141_s11, %s4352_s5 }
 0x378   : > { %2092 = vmatpush.bf16.msra.mxu2 %v2691_v56 }
 0x379   : > { %3113 = vrot.lane.b32.xlu0 %v3112_v34, %s3193_s23  ;;  %s3142_s23 = scalar_lea.hbm %s3141_s11, 64 }
 0x37a   : > { %2124 = vmatpush.bf16.msra.mxu3 %v2696_v4  ;;  %p3143_p11 = scmp.ne.s32.totalorder %s3141_s11, %s3142_s23  ;;  %p3148_p1 = scmp.lt.s32.totalorder %s3146_s14, %s3142_s23 }
 0x37c   : > { %2633 = vmatmul.msk.bf16.gmra.mxu0 %vm224_vm0, %v1925_v38  ;;  %2093 = vmatpush.bf16.msra.mxu2 %v2690_v12  ;;  %p3144_p12 = pnand %p3143_p11, %p3264_p5  ;;  %p3149_p2 = por %p3148_p1, %p3147_p0 }
 0x37d   : > { %3118 = vrot.lane.b32.xlu1 %v3117_v61, %s3192_s17  ;;  %s4275_s17 = scalar_lea.vmem [#allocation3], %s2281_s30 }
 0x37e   : > { %s2212_s10 = sshll.u32 %s4275_s17, 4  ;;  %p3145_p13 = pneg %p3144_p12  ;;  %s2213_s10 = int_to_ptr.vmem [resolvable:$true] %s2212_s10 }
 0x380   : > { %2094 = vmatpush.bf16.msra.mxu2 %v2689_v15  ;;  %p3150_p3 = pnand %p3149_p2, %p3145_p13 }
 0x384   : > { %2095 = vmatpush.bf16.msra.mxu2 %v2688_v40 }
 0x397   : > { %v3004_v44 = vpop.permute.xlu2 %3003 }
 0x398   : > { %v3006_v0 = vunpack.i.h.bf16 %v3004_v44  ;;  %v3005_v25 = vunpack.i.l.bf16 %v3004_v44 }
 0x39a   : > { %v1867_v33 = vsel %vm224_vm0, %v4025_v47, %v3006_v0  ;;  %v1866_v1 = vsel %vm224_vm0, %v4021_v42, %v3005_v25 }
 0x39f   : > { %v3019_v59 = vpop.permute.xlu2 %3018 }
 0x3a0   : > { %v3021_v41 = vunpack.i.h.bf16 %v3019_v59  ;;  %v3020_v61 = vunpack.i.l.bf16 %v3019_v59 }
 0x3a2   : > { %v1891_v42 = vsel %vm224_vm0, %v4062_v43, %v3021_v41  ;;  %v1890_v21 = vsel %vm224_vm0, %v4035_v58, %v3020_v61 }
 0x3a7   : > { %v3034_v11 = vpop.permute.xlu2 %3033 }
 0x3a8   : > { %v3036_v59 = vunpack.i.h.bf16 %v3034_v11 }
 0x3aa   : > { %v1869_v58 = vsel %vm224_vm0, %v4050_v48, %v3036_v59 }
 0x3ae   : > { %v3009_v24 = vpop.permute.xlu0 %3008 }
 0x3af   : > { %v3011_v8 = vunpack.i.h.bf16 %v3009_v24  ;;  %v3010_v14 = vunpack.i.l.bf16 %v3009_v24  ;;  %v3049_v20 = vpop.permute.xlu2 %3048  ;;  %v3035_v24 = vunpack.i.l.bf16 %v3034_v11 }
 0x3b0   : > { %v3050_v11 = vunpack.i.l.bf16 %v3049_v20 }
 0x3b1   : > { %v1874_v35 = vsel %vm664_vm5, %v1866_v1, %v3010_v14  ;;  %v1875_v50 = vsel %vm664_vm5, %v1867_v33, %v3011_v8  ;;  %v1868_v8 = vsel %vm224_vm0, %v4040_v32, %v3035_v24 }
 0x3b2   : > { %v1892_v41 = vsel %vm224_vm0, %v4065_v6, %v3050_v11 }
 0x3b3   : > { %v3014_v49 = vpop.permute.xlu1 %3013 }
 0x3b4   : > { %v3016_v45 = vunpack.i.h.bf16 %v3014_v49  ;;  %v3015_v26 = vunpack.i.l.bf16 %v3014_v49 }
 0x3b6   : > { %v1882_v34 = vsel %vm673_vm6, %v1874_v35, %v3015_v26  ;;  %v1883_v31 = vsel %vm673_vm6, %v1875_v50, %v3016_v45 }
 0x3b7   : > { %v1914_v38 = vpack.c.bf16 %v1883_v31, %v1882_v34  ;;  %v3064_v35 = vpop.permute.xlu2 %3063  ;;  %v3051_v31 = vunpack.i.h.bf16 %v3049_v20 }
 0x3b8   : > { %v3066_v20 = vunpack.i.h.bf16 %v3064_v35 }
 0x3b9   : > { %2096 = vmatmul.bf16.vlgmr.msra.gmra.mxu2 %v1914_v38  ;;  %v1893_v32 = vsel %vm224_vm0, %v4095_v16, %v3051_v31 }
 0x3ba   : > { %v1871_v6 = vsel %vm224_vm0, %v4083_v22, %v3066_v20 }
 0x3bb   : > { %v3024_v39 = vpop.permute.xlu0 %3023 }
 0x3bc   : > { %v3026_v47 = vunpack.i.h.bf16 %v3024_v39  ;;  %v3025_v62 = vunpack.i.l.bf16 %v3024_v39 }
 0x3be   : > { %v1898_v12 = vsel %vm664_vm5, %v1890_v21, %v3025_v62  ;;  %v1899_v15 = vsel %vm664_vm5, %v1891_v42, %v3026_v47 }
 0x3bf   : > { %v3029_v54 = vpop.permute.xlu1 %3028 }
 0x3c0   : > { %v3031_v18 = vunpack.i.h.bf16 %v3029_v54  ;;  %v3030_v56 = vunpack.i.l.bf16 %v3029_v54 }
 0x3c2   : > { %v1906_v40 = vsel %vm673_vm6, %v1898_v12, %v3030_v56  ;;  %v1907_v46 = vsel %vm673_vm6, %v1899_v15, %v3031_v18  ;;  %v3065_v12 = vunpack.i.l.bf16 %v3064_v35  ;;  %v3079_v15 = vpop.permute.xlu2 %3078 }
 0x3c3   : > { %v1915_v4 = vpack.c.bf16 %v1907_v46, %v1906_v40  ;;  %v3039_v44 = vpop.permute.xlu0 %3038 }
 0x3c4   : > { %v3041_v0 = vunpack.i.h.bf16 %v3039_v44  ;;  %v3040_v43 = vunpack.i.l.bf16 %v3039_v44 }
 0x3c5   : > { %2125 = vmatmul.bf16.vlgmr.msra.gmra.mxu3 %v1915_v4  ;;  %v1870_v4 = vsel %vm224_vm0, %v4072_v19, %v3065_v12 }
 0x3c6   : > { %v1876_v33 = vsel %vm664_vm5, %v1868_v8, %v3040_v43  ;;  %v1877_v1 = vsel %vm664_vm5, %v1869_v58, %v3041_v0 }
 0x3c7   : > { %v3044_v25 = vpop.permute.xlu1 %3043 }
 0x3c8   : > { %v3046_v14 = vunpack.i.h.bf16 %v3044_v25  ;;  %v3045_v49 = vunpack.i.l.bf16 %v3044_v25 }
 0x3ca   : > { %v1884_v45 = vsel %vm673_vm6, %v1876_v33, %v3045_v49  ;;  %v1885_v26 = vsel %vm673_vm6, %v1877_v1, %v3046_v14  ;;  %v3081_v14 = vunpack.i.h.bf16 %v3079_v15  ;;  %v3080_v49 = vunpack.i.l.bf16 %v3079_v15  ;;  %v3094_v22 = vpop.permute.xlu2 %3093 }
 0x3cb   : > { %v3054_v50 = vpop.permute.xlu0 %3053  ;;  %v1917_v34 = vpack.c.bf16 %v1885_v26, %v1884_v45 }
 0x3cc   : > { %v3056_v38 = vunpack.i.h.bf16 %v3054_v50  ;;  %v3055_v48 = vunpack.i.l.bf16 %v3054_v50  ;;  %v1895_v19 = vsel %vm224_vm0, %v4136_v53, %v3081_v14  ;;  %v1894_v26 = vsel %vm224_vm0, %v4098_v10, %v3080_v49  ;;  %v2155_v14 = vpop.f32.mrf.mxu0 }
 0x3cd   : > { %2101 = vmatmul.bf16.gmra.mxu2 %v1917_v34 }
 0x3ce   : > { %v1900_v62 = vsel %vm664_vm5, %v1892_v41, %v3055_v48  ;;  %v1901_v54 = vsel %vm664_vm5, %v1893_v32, %v3056_v38  ;;  %v3096_v32 = vunpack.i.h.bf16 %v3094_v22  ;;  %v3095_v41 = vunpack.i.l.bf16 %v3094_v22 }
 0x3cf   : > { %v3059_v39 = vpop.permute.xlu1 %3058 }
 0x3d0   : > { %v3061_v61 = vunpack.i.h.bf16 %v3059_v39  ;;  %v3060_v47 = vunpack.i.l.bf16 %v3059_v39  ;;  %v1873_v10 = vsel %vm224_vm0, %v4125_v37, %v3096_v32 }
 0x3d2   : > { %v1908_v42 = vsel %vm673_vm6, %v1900_v62, %v3060_v47  ;;  %v1909_v21 = vsel %vm673_vm6, %v1901_v54, %v3061_v61  ;;  %v1872_v62 = vsel %vm224_vm0, %v4108_v55, %v3095_v41 }
 0x3d3   : > { %v3069_v18 = vpop.permute.xlu0 %3068  ;;  %v1918_v56 = vpack.c.bf16 %v1909_v21, %v1908_v42  ;;  %v3109_v21 = vpop.permute.xlu2 %3108 }
 0x3d4   : > { %v3071_v40 = vunpack.i.h.bf16 %v3069_v18  ;;  %v3070_v16 = vunpack.i.l.bf16 %v3069_v18 }
 0x3d5   : > { %2130 = vmatmul.bf16.gmra.mxu3 %v1918_v56 }
 0x3d6   : > { %v1878_v24 = vsel %vm664_vm5, %v1870_v4, %v3070_v16  ;;  %v1879_v0 = vsel %vm664_vm5, %v1871_v6, %v3071_v40  ;;  %v3111_v16 = vunpack.i.h.bf16 %v3109_v21 }
 0x3d7   : > { %v3074_v46 = vpop.permute.xlu1 %3073 }
 0x3d8   : > { %v3076_v44 = vunpack.i.h.bf16 %v3074_v46  ;;  %v3075_v59 = vunpack.i.l.bf16 %v3074_v46  ;;  %v3110_v46 = vunpack.i.l.bf16 %v3109_v21  ;;  %v1897_v55 = vsel %vm224_vm0, %v4153_v36, %v3111_v16  ;;  %v4266_v36 = vld [vmem:[%s4351_s4 + $0x2] ss:$0 sm:$0xff] }
 0x3da   : > { %v1886_v43 = vsel %vm673_vm6, %v1878_v24, %v3075_v59  ;;  %v1887_v25 = vsel %vm673_vm6, %v1879_v0, %v3076_v44  ;;  %v1896_v44 = vsel %vm224_vm0, %v4139_v9, %v3110_v46  ;;  %v2157_v9 = vpop.f32.mrf.mxu0 }
 0x3db   : > { %v3084_v58 = vpop.permute.xlu0 %3083  ;;  %v1920_v8 = vpack.c.bf16 %v1887_v25, %v1886_v43 }
 0x3dc   : > { %v3086_v33 = vunpack.i.h.bf16 %v3084_v58  ;;  %v3085_v1 = vunpack.i.l.bf16 %v3084_v58 }
 0x3dd   : > { %2106 = vmatmul.bf16.gmra.mxu2 %v1920_v8 }
 0x3de   : > { %v1902_v34 = vsel %vm664_vm5, %v1894_v26, %v3085_v1  ;;  %v1903_v31 = vsel %vm664_vm5, %v1895_v19, %v3086_v33 }
 0x3df   : > { %v3089_v45 = vpop.permute.xlu1 %3088 }
 0x3e0   : > { %v3091_v35 = vunpack.i.h.bf16 %v3089_v45  ;;  %v3090_v50 = vunpack.i.l.bf16 %v3089_v45 }
 0x3e2   : > { %v1910_v11 = vsel %vm673_vm6, %v1902_v34, %v3090_v50  ;;  %v1911_v38 = vsel %vm673_vm6, %v1903_v31, %v3091_v35  ;;  %v2160_v35 = vpop.f32.mrf.mxu0 }
 0x3e3   : > { %v3099_v48 = vpop.permute.xlu0 %3098  ;;  %v1921_v39 = vpack.c.bf16 %v1911_v38, %v1910_v11 }
 0x3e4   : > { %v3101_v61 = vunpack.i.h.bf16 %v3099_v48  ;;  %v3100_v47 = vunpack.i.l.bf16 %v3099_v48 }
 0x3e5   : > { %2135 = vmatmul.bf16.gmra.mxu3 %v1921_v39 }
 0x3e6   : > { %v1880_v18 = vsel %vm664_vm5, %v1872_v62, %v3100_v47  ;;  %v1881_v56 = vsel %vm664_vm5, %v1873_v10, %v3101_v61 }
 0x3e7   : > { %v3104_v53 = vpop.permute.xlu1 %3103 }
 0x3e8   : > { %v3106_v54 = vunpack.i.h.bf16 %v3104_v53  ;;  %v3105_v42 = vunpack.i.l.bf16 %v3104_v53 }
 0x3ea   : > { %v1888_v20 = vsel %vm673_vm6, %v1880_v18, %v3105_v42  ;;  %v1889_v12 = vsel %vm673_vm6, %v1881_v56, %v3106_v54  ;;  %v2162_v47 = vpop.f32.mrf.mxu0 }
 0x3eb   : > { %v3114_v15 = vpop.permute.xlu0 %3113  ;;  %v1923_v40 = vpack.c.bf16 %v1889_v12, %v1888_v20 }
 0x3ec   : > { %v3116_v6 = vunpack.i.h.bf16 %v3114_v15  ;;  %v3115_v37 = vunpack.i.l.bf16 %v3114_v15 }
 0x3ed   : > { %2111 = vmatmul.bf16.gmra.mxu2 %v1923_v40 }
 0x3ee   : > { %v1904_v0 = vsel %vm664_vm5, %v1896_v44, %v3115_v37  ;;  %v1905_v43 = vsel %vm664_vm5, %v1897_v55, %v3116_v6 }
 0x3ef   : > { %v3119_v4 = vpop.permute.xlu1 %3118 }
 0x3f0   : > { %v3121_v59 = vunpack.i.h.bf16 %v3119_v4  ;;  %v3120_v24 = vunpack.i.l.bf16 %v3119_v4 }
 0x3f2   : > { %v1912_v25 = vsel %vm673_vm6, %v1904_v0, %v3120_v24  ;;  %v1913_v58 = vsel %vm673_vm6, %v1905_v43, %v3121_v59  ;;  %v2165_v18 = vpop.f32.mrf.mxu0 }
 0x3f3   : > { %v1924_v8 = vpack.c.bf16 %v1913_v58, %v1912_v25 }
 0x3f5   : > { %2140 = vmatmul.bf16.gmra.mxu3 %v1924_v8 }
 0x3fa   : > { %v2167_v46 = vpop.f32.mrf.mxu0 }
 0x402   : > { %v2170_v52 = vpop.f32.mrf.mxu0 }
 0x43c   : > { %v2097_v49 = vpop.f32.mrf.mxu2 }
 0x43d   : > { %v2098_v33 = vadd.f32 %v4266_v36, %v2097_v49  ;;  %v2172_v49 = vpop.f32.mrf.mxu0 }
 0x444   : > { %v2099_v1 = vpop.f32.mrf.mxu2 }
 0x445   : > { %v2100_v50 = vadd.f32 %v4266_v36, %v2099_v1 }
 0x448   : > { %v2126_v22 = vpop.f32.mrf.mxu3 }
 0x449   : > { %v2127_v45 = vadd.f32 %v2126_v22, %v2098_v33 }
 0x44b   : > { %v2156_v19 = vadd.f32 %v2155_v14, %v2127_v45 }
 0x44d   : > { %v2175_v26 = vadd.f32 %v2156_v19, %v1005_v27 }
 0x44f   : > { %v2183_v34 = vmax.f32 %v2175_v26, 0.0 }
 0x450   : > { %v2102_v31 = vpop.f32.mrf.mxu2  ;;  %v2128_v11 = vpop.f32.mrf.mxu3 }
 0x451   : > { %2191 = vst.msk [vmem:[%s4275_s17] sm:$0xff] %vm224_vm0, %v2183_v34  ;;  %v2129_v38 = vadd.f32 %v2128_v11, %v2100_v50  ;;  %v2103_v2 = vadd.f32 %v4266_v36, %v2102_v31 }
 0x453   : > { %v2158_v48 = vadd.f32 %v2157_v9, %v2129_v38 }
 0x455   : > { %v2176_v39 = vadd.f32 %v2158_v48, %v1006_v17 }
 0x457   : > { %v2184_v27 = vmax.f32 %v2176_v39, 0.0 }
 0x458   : > { %v2104_v32 = vpop.f32.mrf.mxu2  ;;  %v2131_v41 = vpop.f32.mrf.mxu3 }
 0x459   : > { %2192 = vst.msk [vmem:[%s4275_s17 + $0x8] sm:$0xff] %vm224_vm0, %v2184_v27  ;;  %v2132_v61 = vadd.f32 %v2131_v41, %v2103_v2  ;;  %v2105_v62 = vadd.f32 %v4266_v36, %v2104_v32 }
 0x45b   : > { %v2161_v53 = vadd.f32 %v2160_v35, %v2132_v61 }
 0x45d   : > { %v2177_v10 = vadd.f32 %v2161_v53, %v1007_v23 }
 0x45f   : > { %v2185_v54 = vmax.f32 %v2177_v10, 0.0 }
 0x460   : > { %v2107_v42 = vpop.f32.mrf.mxu2  ;;  %v2133_v13 = vpop.f32.mrf.mxu3 }
 0x461   : > { %2193 = vst.msk [vmem:[%s4275_s17 + $0x10] sm:$0xff] %vm224_vm0, %v2185_v54  ;;  %v2134_v17 = vadd.f32 %v2133_v13, %v2105_v62  ;;  %v2108_v20 = vadd.f32 %v4266_v36, %v2107_v42 }
 0x463   : > { %v2163_v21 = vadd.f32 %v2162_v47, %v2134_v17 }
 0x465   : > { %v2178_v56 = vadd.f32 %v2163_v21, %v1008_v60 }
 0x467   : > { %v2186_v12 = vmax.f32 %v2178_v56, 0.0 }
 0x468   : > { %v2109_v15 = vpop.f32.mrf.mxu2  ;;  %v2136_v57 = vpop.f32.mrf.mxu3 }
 0x469   : > { %2194 = vst.msk [vmem:[%s4275_s17 + $0x18] sm:$0xff] %vm224_vm0, %v2186_v12  ;;  %v2137_v23 = vadd.f32 %v2136_v57, %v2108_v20  ;;  %v2110_v6 = vadd.f32 %v4266_v36, %v2109_v15 }
 0x46b   : > { %v2166_v40 = vadd.f32 %v2165_v18, %v2137_v23 }
 0x46d   : > { %v2179_v16 = vadd.f32 %v2166_v40, %v1009_v63 }
 0x46f   : > { %v2187_v37 = vmax.f32 %v2179_v16, 0.0 }
 0x470   : > { %v2138_v7 = vpop.f32.mrf.mxu3  ;;  %v2112_v4 = vpop.f32.mrf.mxu2 }
 0x471   : > { %2195 = vst.msk [vmem:[%s4275_s17 + $0x20] sm:$0xff] %vm224_vm0, %v2187_v37  ;;  %v2139_v60 = vadd.f32 %v2138_v7, %v2110_v6  ;;  %v2113_v59 = vadd.f32 %v4266_v36, %v2112_v4 }
 0x473   : > { %v2168_v55 = vadd.f32 %v2167_v46, %v2139_v60 }
 0x475   : > { %v2180_v44 = vadd.f32 %v2168_v55, %v1010_v30 }
 0x477   : > { %v2188_v24 = vmax.f32 %v2180_v44, 0.0 }
 0x478   : > { %v2141_v63 = vpop.f32.mrf.mxu3  ;;  %v2114_v25 = vpop.f32.mrf.mxu2 }
 0x479   : > { %2196 = vst.msk [vmem:[%s4275_s17 + $0x28] sm:$0xff] %vm224_vm0, %v2188_v24  ;;  %v2142_v0 = vadd.f32 %v2141_v63, %v2113_v59  ;;  %v2115_v51 = vadd.f32 %v4266_v36, %v2114_v25 }
 0x47b   : > { %v2171_v43 = vadd.f32 %v2170_v52, %v2142_v0 }
 0x47d   : > { %v2181_v58 = vadd.f32 %v2171_v43, %v1011_v28 }
 0x47f   : > { %v2189_v30 = vmax.f32 %v2181_v58, 0.0 }
 0x480   : > { %v2143_v8 = vpop.f32.mrf.mxu3 }
 0x481   : > { %2197 = vst.msk [vmem:[%s4275_s17 + $0x30] sm:$0xff] %vm224_vm0, %v2189_v30  ;;  %v2144_v14 = vadd.f32 %v2143_v8, %v2115_v51 }
 0x483   : > { %v2173_v9 = vadd.f32 %v2172_v49, %v2144_v14 }
 0x485   : > { %v2182_v29 = vadd.f32 %v2173_v9, %v1012_v5 }
 0x487   : > { %v2190_v28 = vmax.f32 %v2182_v29, 0.0 }
 0x489   : > { %2198 = vst.msk [vmem:[%s4275_s17 + $0x38] sm:$0xff] %vm224_vm0, %v2190_v28 }
 0x48a   : > { %3153 = shalt.err (!%p3150_p3)
}
 0x48b   : > { %s3194_s26 = smov 128   ;;  %s3195_s30 = smov 8  }
 0x48c   : > { %2717 = dma.vmem_to_hbm [thread:$0]  (%p3264_p5), %s2213_s10, 1024, %s2215_s16, %s2200_s22, %s3194_s26, %s3194_s26, %s3195_s30  }
 0x48d PF: > { %p2723_p4 = scmp.ge.s32.totalorder %s3188_s21, 2  ;;  %s2229_s17 = sand.u32 1, %s3176_s18  }
 0x48e   : > { %s2230_s6 = scalar_lea.sflag [#allocation4], %s2229_s17 }
 0x48f   : > { %p2720_p7 = pnand %p2723_p4, %p3268_p6 }
 0x491   : > { %p2721_p8 = pneg %p2720_p7 }
 0x493   : > { %3171 = dma.done.wait (%p2721_p8), %s2230_s6, 1024  }
 0x494   : > { %3173 = vsyncadd (%p2721_p8), %s2230_s6, 4294966272  ;;  %p15_p9 = scmp.ge.s32.totalorder %s3251_s24, 4   ;;  %s4355_s18 = smov %s3180_s19 }
 0x495   : > { %s4356_s19 = smov %s3184_s20  ;;  %s4357_s20 = smov %s3262_s27 }
 0x496   : > { %s4358_s21 = smov %s3251_s24  ;;  %17 = sbr.rel (!%p15_p9) target bundleno = 3 (0x3), region = 81 }
 0x49b   :  { %2236 = vsyncpa [#allocation4], 1 }
 0x49c   :  { %2238 = vsyncpa [#allocation4 + $0x1], 1 }

</bundles_post_ra>
